<compile_context>
chip_gen: v6e
topology: v6e:2x2x1
jax: 0.10.0
libtpu: 0.0.40
codegen_flags: <defaults>
</compile_context>

<pallas_src>
import functools
import math

import jax
import jax.numpy as jnp
from jax.experimental import pallas as pl
from jax.experimental.pallas import tpu as pltpu


def _round_up(x, m):
    return ((x + m - 1) // m) * m


# ---------------------------------------------------------------------------
# Pass 1: attention / masked softmax / pooling / linear_transform.
# ---------------------------------------------------------------------------
def attention_kernel(att_dim, emb_ref, last_emb_ref, mask_ref, wq_ref, wk_ref,
                     wlin_a_ref, wlin_b_ref, blin_ref, frep_ref, aff_ref):
    e = emb_ref[...].astype(jnp.float32)                 # (TB, S, Hp)
    tb, s, hp = e.shape
    a_pad = wq_ref.shape[1]
    m = mask_ref[...]                                    # (TB, S) f32

    # Q / K projections as one 2-D GEMM each (M = TB*S fills the MXU).
    e2 = e.reshape(tb * s, hp)
    q = jax.nn.sigmoid(jnp.dot(e2, wq_ref[...],
                               preferred_element_type=jnp.float32))
    k = jax.nn.sigmoid(jnp.dot(e2, wk_ref[...],
                               preferred_element_type=jnp.float32))
    # attention_dim is zero-padded to a_pad lanes; sigmoid(0)=0.5 in the padded
    # columns, so zero them on K so the extra columns cancel in Q @ K^T.
    a_idx = jax.lax.broadcasted_iota(jnp.int32, (1, a_pad), 1)
    k = k * (a_idx < att_dim).astype(jnp.float32)
    q = q.reshape(tb, s, a_pad)
    k = k.reshape(tb, s, a_pad)

    # affinity = Q @ K^T / sqrt(attention_dim) (pre-masking, as the PyTorch
    # reference returns it).
    aff = jnp.einsum('bsa,bta->bst', q, k,
                     preferred_element_type=jnp.float32)
    aff = aff * jnp.float32(1.0 / math.sqrt(att_dim))
    aff_ref[...] = aff

    # zero the diagonal (affinity - diag_embed(diagonal(affinity)))
    rows = jax.lax.broadcasted_iota(jnp.int32, (s, s), 0)
    cols = jax.lax.broadcasted_iota(jnp.int32, (s, s), 1)
    off_diag = (rows != cols).astype(jnp.float32)
    masked_aff = aff * off_diag[None]

    # column mask -> row sum -> row mask
    item_score = jnp.sum(masked_aff * m[:, None, :], axis=2) * m     # (TB, S)

    # softmax over the sequence dim, re-mask, re-normalise.  Denominators are
    # eps-guarded so all-zero-mask rows (batch padding / empty sessions) stay
    # finite; divides go through the EUP via approx reciprocal.
    item_score = item_score - jnp.max(item_score, axis=1, keepdims=True)
    ex = jnp.exp(item_score)
    p = ex * pl.reciprocal(
        jnp.maximum(jnp.sum(ex, axis=1, keepdims=True), 1e-9), approx=True)
    p = p * m
    p = p * pl.reciprocal(
        jnp.maximum(jnp.sum(p, axis=1, keepdims=True), 1e-9), approx=True)

    # attention-pooled session representation.
    att_final = jnp.sum(p[:, :, None] * e, axis=1)                   # (TB, Hp)

    # final_rep = Linear(concat([att_final, last_emb], 1)) without the
    # lane-axis concat: W_lin^T is split into its two (Hp, Hp) halves.
    final_rep = (
        jnp.dot(att_final, wlin_a_ref[...],
                preferred_element_type=jnp.float32)
        + jnp.dot(last_emb_ref[...].astype(jnp.float32), wlin_b_ref[...],
                  preferred_element_type=jnp.float32)
        + blin_ref[...])
    frep_ref[...] = final_rep.astype(jnp.bfloat16)


# ---------------------------------------------------------------------------
# Pass 2: streamed scoring GEMM  (TB, Hp) x (TN, Hp)^T -> (TB, TN).
# ---------------------------------------------------------------------------
def scoring_kernel(frep_ref, emb_tail_ref, scores_ref):
    scores_ref[...] = jax.lax.dot_general(
        frep_ref[...], emb_tail_ref[...],
        dimension_numbers=(((1,), (1,)), ((), ())),
        preferred_element_type=jnp.float32).astype(scores_ref.dtype)


# ---------------------------------------------------------------------------
# One-time table / weight preparation (hoisted off the per-call path).
# ---------------------------------------------------------------------------
def prepare_params(params, *, tn=4096):
    emb = params['embedding']                            # (N, H) f32
    N, H = emb.shape
    att_dim = params['wq_t'].shape[1]
    Hp = _round_up(H, 128)
    Ap = _round_up(att_dim, 128)
    NT = N - 1

    emb_bf = jnp.zeros((N, Hp), jnp.bfloat16).at[:, :H].set(
        emb.astype(jnp.bfloat16))

    tn_eff = min(_round_up(tn, 128), _round_up(NT, 128))
    n_pad = _round_up(NT, tn_eff)
    emb_tail = jnp.zeros((n_pad, Hp), jnp.bfloat16).at[:NT].set(emb_bf[1:])

    wq_t = jnp.zeros((Hp, Ap), jnp.float32).at[:H, :att_dim].set(params['wq_t'])
    wk_t = jnp.zeros((Hp, Ap), jnp.float32).at[:H, :att_dim].set(params['wk_t'])
    wlin_a_t = jnp.zeros((Hp, Hp), jnp.float32).at[:H, :H].set(
        params['wlin_t'][:H])
    wlin_b_t = jnp.zeros((Hp, Hp), jnp.float32).at[:H, :H].set(
        params['wlin_t'][H:2 * H])
    blin = jnp.zeros((1, Hp), jnp.float32).at[:, :H].set(params['blin'])

    return dict(emb_bf=emb_bf, emb_tail=emb_tail, wq_t=wq_t, wk_t=wk_t,
                wlin_a_t=wlin_a_t, wlin_b_t=wlin_b_t, blin=blin,
                n_node=N, hidden=H, att_dim=att_dim, hp=Hp, ap=Ap,
                tn_eff=tn_eff, n_pad=n_pad)


def sriem_forward(inputs, masks, params, prepared=None, *, tb_max=128,
                  scores_dtype=jnp.float32):
    if prepared is None:
        prepared = prepare_params(params)
    B, S = inputs.shape
    N, H = prepared['n_node'], prepared['hidden']
    Hp, Ap = prepared['hp'], prepared['ap']
    att_dim = prepared['att_dim']
    tn_eff, n_pad = prepared['tn_eff'], prepared['n_pad']
    NT = N - 1

    # --- JAX glue: data-dependent embedding gathers (bf16, lane-padded) ---
    m = masks.astype(jnp.float32)
    inputs_emb = prepared['emb_bf'][inputs]              # (B, S, Hp) bf16
    last_idx = jnp.maximum(jnp.sum(m, axis=1).astype(jnp.int32) - 1, 0)
    last_id = inputs[jnp.arange(B), last_idx]
    last_emb = prepared['emb_bf'][last_id]               # (B, Hp) bf16

    # --- batch tiling: multiple of 8, up to tb_max (128) ---
    tb = min(_round_up(B, 8), _round_up(tb_max, 8))
    b_pad = _round_up(B, tb)
    if b_pad != B:
        pad_b = b_pad - B
        inputs_emb = jnp.pad(inputs_emb, ((0, pad_b), (0, 0), (0, 0)))
        last_emb = jnp.pad(last_emb, ((0, pad_b), (0, 0)))
        m = jnp.pad(m, ((0, pad_b), (0, 0)))

    def _vmem_limit(estimate):
        # headroom x2, but stay v7x-safe (64 MiB physical per TC).
        return int(min(max(estimate * 2, 32 * 2**20), 56 * 2**20))

    # ----------------- pass 1: attention / final_rep ------------------------
    att_est = (2 * tb * S * Hp * 2          # inputs_emb bf16 (double buffered)
               + 2 * tb * Hp * 2            # last_emb
               + 2 * tb * S * 4             # masks
               + 4 * Hp * Ap * 4            # W_Q^T, W_K^T
               + 4 * Hp * Hp * 4            # W_lin^T halves
               + 2 * tb * Hp * 2            # frep out
               + 2 * tb * S * S * 4         # affinity out
               + 3 * tb * S * Hp * 4        # f32 upcast + q/k temps
               + 2 * tb * S * Ap * 4
               + 2 * tb * S * S * 4)        # affinity temps
    kernel1 = functools.partial(attention_kernel, att_dim)
    frep, aff_pad = pl.pallas_call(
        kernel1,
        out_shape=(jax.ShapeDtypeStruct((b_pad, Hp), jnp.bfloat16),
                   jax.ShapeDtypeStruct((b_pad, S, S), jnp.float32)),
        grid_spec=pltpu.PrefetchScalarGridSpec(
            num_scalar_prefetch=0,
            grid=(b_pad // tb,),
            in_specs=[
                pl.BlockSpec((tb, S, Hp), lambda i: (i, 0, 0)),   # inputs_emb
                pl.BlockSpec((tb, Hp), lambda i: (i, 0)),         # last_emb
                pl.BlockSpec((tb, S), lambda i: (i, 0)),          # masks
                pl.BlockSpec((Hp, Ap), lambda i: (0, 0)),         # W_Q^T
                pl.BlockSpec((Hp, Ap), lambda i: (0, 0)),         # W_K^T
                pl.BlockSpec((Hp, Hp), lambda i: (0, 0)),         # W_lin^T top
                pl.BlockSpec((Hp, Hp), lambda i: (0, 0)),         # W_lin^T bot
                pl.BlockSpec((1, Hp), lambda i: (0, 0)),          # bias
            ],
            out_specs=(
                pl.BlockSpec((tb, Hp), lambda i: (i, 0)),         # final_rep
                pl.BlockSpec((tb, S, S), lambda i: (i, 0, 0)),    # affinity
            ),
        ),
        compiler_params=pltpu.CompilerParams(
            dimension_semantics=("parallel",),
            vmem_limit_bytes=_vmem_limit(att_est)),
    )(inputs_emb, last_emb, m, prepared['wq_t'], prepared['wk_t'],
      prepared['wlin_a_t'], prepared['wlin_b_t'], prepared['blin'])

    # ----------------- pass 2: scoring GEMM ---------------------------------
    # Vocab axis OUTER, batch axis INNER: the emb_tail block index is constant
    # across the inner sweep, so each table tile is fetched from HBM once per
    # launch.  No carry -> both axes parallel (megacore-shardable).
    score_bytes = jnp.dtype(scores_dtype).itemsize
    score_est = (2 * tn_eff * Hp * 2 + 2 * tb * Hp * 2
                 + 2 * tb * tn_eff * score_bytes)
    scores_pad = pl.pallas_call(
        scoring_kernel,
        out_shape=jax.ShapeDtypeStruct((b_pad, n_pad), scores_dtype),
        grid_spec=pltpu.PrefetchScalarGridSpec(
            num_scalar_prefetch=0,
            grid=(n_pad // tn_eff, b_pad // tb),
            in_specs=[
                pl.BlockSpec((tb, Hp), lambda j, i: (i, 0)),      # final_rep
                pl.BlockSpec((tn_eff, Hp), lambda j, i: (j, 0)),  # emb tail
            ],
            out_specs=pl.BlockSpec((tb, tn_eff), lambda j, i: (i, j)),
        ),
        compiler_params=pltpu.CompilerParams(
            dimension_semantics=("parallel", "parallel"),
            vmem_limit_bytes=_vmem_limit(score_est)),
    )(frep, prepared['emb_tail'])

    return scores_pad[:B, :NT], aff_pad[:B]


def init_params(key, n_node, hidden_size, attention_dim=100):
    # reset_parameters(): all weights ~ U(-stdv, stdv), stdv = 1/sqrt(hidden)
    stdv = 1.0 / math.sqrt(hidden_size)
    ks = jax.random.split(key, 5)
    u = lambda k, shape: jax.random.uniform(k, shape, jnp.float32, -stdv, stdv)
    return dict(
        embedding=u(ks[0], (n_node, hidden_size)),            # nn.Embedding
        wq_t=u(ks[1], (hidden_size, attention_dim)),          # Q.weight^T
        wk_t=u(ks[2], (hidden_size, attention_dim)),          # K.weight^T
        wlin_t=u(ks[3], (2 * hidden_size, hidden_size)),      # linear_transform.weight^T
        blin=u(ks[4], (1, hidden_size)),                      # linear_transform.bias
    )


if __name__ == "__main__":
    key = jax.random.PRNGKey(0)
    B, S, H, N = 2, 8, 32, 20                          # batch, seq, hidden, n_node
    kp, ki = jax.random.split(key)
    params = init_params(kp, N, H)

    inputs = jax.random.randint(ki, (B, S), 1, N).astype(jnp.int32)
    lengths = jnp.array([5, 8], dtype=jnp.int32)       # valid (non-empty) sessions
    masks = (jnp.arange(S)[None, :] < lengths[:, None]).astype(jnp.float32)

    prepared = prepare_params(params)                  # one-time table padding
    scores, affinity = sriem_forward(inputs, masks, params, prepared)
    jax.block_until_ready((scores, affinity))
    assert scores.shape == (B, N - 1)
    assert affinity.shape == (B, S, S)
    assert bool(jnp.all(jnp.isfinite(scores)))
    assert bool(jnp.all(jnp.isfinite(affinity)))
    print("KERNEL_OK")
</pallas_src>

<mosaic_0001>
module attributes {stable_mosaic.version = 11 : i64} {
  func.func @attention_kernel(%arg0: i32, %arg1: memref<8x8x128xbf16, #tpu.memory_space<vmem>>, %arg2: memref<8x128xbf16, #tpu.memory_space<vmem>>, %arg3: memref<8x8xf32, #tpu.memory_space<vmem>>, %arg4: memref<128x128xf32, #tpu.memory_space<vmem>>, %arg5: memref<128x128xf32, #tpu.memory_space<vmem>>, %arg6: memref<128x128xf32, #tpu.memory_space<vmem>>, %arg7: memref<128x128xf32, #tpu.memory_space<vmem>>, %arg8: memref<1x128xf32, #tpu.memory_space<vmem>>, %arg9: memref<8x128xbf16, #tpu.memory_space<vmem>>, %arg10: memref<8x8x8xf32, #tpu.memory_space<vmem>>) attributes {dimension_semantics = [#tpu.dimension_semantics<parallel>], iteration_bounds = array<i64: 1>, scalar_prefetch = 0 : i64, scratch_operands = 0 : i64, tpu.core_type = #tpu.core_type<tc>, window_params = [{transform_indices = @transform_0, window_bounds = array<i64: 8, 8, 128>}, {transform_indices = @transform_1, window_bounds = array<i64: 8, 128>}, {transform_indices = @transform_2, window_bounds = array<i64: 8, 8>}, {pipeline_mode = #tpu.pipeline_mode<synchronous>, transform_indices = @transform_3, window_bounds = array<i64: 128, 128>}, {pipeline_mode = #tpu.pipeline_mode<synchronous>, transform_indices = @transform_4, window_bounds = array<i64: 128, 128>}, {pipeline_mode = #tpu.pipeline_mode<synchronous>, transform_indices = @transform_5, window_bounds = array<i64: 128, 128>}, {pipeline_mode = #tpu.pipeline_mode<synchronous>, transform_indices = @transform_6, window_bounds = array<i64: 128, 128>}, {pipeline_mode = #tpu.pipeline_mode<synchronous>, transform_indices = @transform_7, window_bounds = array<i64: 1, 128>}, {transform_indices = @transform_8, window_bounds = array<i64: 8, 128>}, {transform_indices = @transform_9, window_bounds = array<i64: 8, 8, 8>}]} {
    %c0 = arith.constant 0 : index
    %c0_0 = arith.constant 0 : index
    %c0_1 = arith.constant 0 : index
    %0 = vector.load %arg1[%c0, %c0_0, %c0_1] : memref<8x8x128xbf16, #tpu.memory_space<vmem>>, vector<8x8x128xbf16>
    %1 = arith.extf %0 : vector<8x8x128xbf16> to vector<8x8x128xf32>
    %c0_2 = arith.constant 0 : index
    %c0_3 = arith.constant 0 : index
    %2 = vector.load %arg3[%c0_2, %c0_3] : memref<8x8xf32, #tpu.memory_space<vmem>>, vector<8x8xf32>
    %3 = vector.shape_cast %1 : vector<8x8x128xf32> to vector<64x128xf32>
    %c0_4 = arith.constant 0 : index
    %c0_5 = arith.constant 0 : index
    %4 = vector.load %arg4[%c0_4, %c0_5] : memref<128x128xf32, #tpu.memory_space<vmem>>, vector<128x128xf32>
    %cst = arith.constant dense<0.000000e+00> : vector<64x128xf32>
    %5 = tpu.matmul %3, %4, %cst {dimension_numbers = #tpu.dot_dimension_numbers<[1], [0], [0], [1], [0, 0, 1, 1], [], []>} : vector<64x128xf32>, vector<128x128xf32>, vector<64x128xf32> -> vector<64x128xf32>
    %6 = arith.negf %5 : vector<64x128xf32>
    %7 = math.exp %6 : vector<64x128xf32>
    %cst_6 = arith.constant 1.000000e+00 : f32
    %8 = vector.broadcast %cst_6 : f32 to vector<64x128xf32>
    %9 = arith.addf %8, %7 : vector<64x128xf32>
    %10 = arith.divf %8, %9 : vector<64x128xf32>
    %c0_7 = arith.constant 0 : index
    %c0_8 = arith.constant 0 : index
    %11 = vector.load %arg5[%c0_7, %c0_8] : memref<128x128xf32, #tpu.memory_space<vmem>>, vector<128x128xf32>
    %cst_9 = arith.constant dense<0.000000e+00> : vector<64x128xf32>
    %12 = tpu.matmul %3, %11, %cst_9 {dimension_numbers = #tpu.dot_dimension_numbers<[1], [0], [0], [1], [0, 0, 1, 1], [], []>} : vector<64x128xf32>, vector<128x128xf32>, vector<64x128xf32> -> vector<64x128xf32>
    %13 = arith.negf %12 : vector<64x128xf32>
    %14 = math.exp %13 : vector<64x128xf32>
    %cst_10 = arith.constant 1.000000e+00 : f32
    %15 = vector.broadcast %cst_10 : f32 to vector<64x128xf32>
    %16 = arith.addf %15, %14 : vector<64x128xf32>
    %17 = arith.divf %15, %16 : vector<64x128xf32>
    %18 = tpu.iota {dimensions = array<i32: 1>} : vector<1x128xi32>
    %c100_i32 = arith.constant 100 : i32
    %19 = vector.broadcast %c100_i32 : i32 to vector<1x128xi32>
    %20 = arith.cmpi slt, %18, %19 : vector<1x128xi32>
    %21 = arith.extui %20 : vector<1x128xi1> to vector<1x128xi32>
    %22 = arith.sitofp %21 : vector<1x128xi32> to vector<1x128xf32>
    %23 = vector.broadcast %22 : vector<1x128xf32> to vector<64x128xf32>
    %24 = arith.mulf %17, %23 : vector<64x128xf32>
    %25 = vector.shape_cast %10 : vector<64x128xf32> to vector<8x8x128xf32>
    %26 = vector.shape_cast %24 : vector<64x128xf32> to vector<8x8x128xf32>
    "tpu.trace_start"() <{level = 10 : i32, message = "bsa,bta->bst"}> : () -> ()
    %cst_11 = arith.constant dense<0.000000e+00> : vector<8x8x8xf32>
    %27 = tpu.matmul %25, %26, %cst_11 {dimension_numbers = #tpu.dot_dimension_numbers<[2], [2], [1], [1], [0, 0, 0, 1, 1, 1], [0], [0]>} : vector<8x8x128xf32>, vector<8x8x128xf32>, vector<8x8x8xf32> -> vector<8x8x8xf32>
    "tpu.trace_stop"() : () -> ()
    %cst_12 = arith.constant 1.000000e-01 : f32
    %28 = vector.broadcast %cst_12 : f32 to vector<8x8x8xf32>
    %29 = arith.mulf %27, %28 : vector<8x8x8xf32>
    %c0_13 = arith.constant 0 : index
    %c0_14 = arith.constant 0 : index
    %c0_15 = arith.constant 0 : index
    %30 = vector.load %arg10[%c0_13, %c0_14, %c0_15] : memref<8x8x8xf32, #tpu.memory_space<vmem>>, vector<8x8x8xf32>
    tpu.vector_store %arg10[%c0_13, %c0_14, %c0_15], %29 {strides = array<i32>} : memref<8x8x8xf32, #tpu.memory_space<vmem>>, vector<8x8x8xf32>,
    %31 = tpu.iota {dimensions = array<i32: 0>} : vector<8x8xi32>
    %32 = tpu.iota {dimensions = array<i32: 1>} : vector<8x8xi32>
    %33 = arith.cmpi ne, %31, %32 : vector<8x8xi32>
    %34 = arith.extui %33 : vector<8x8xi1> to vector<8x8xi32>
    %35 = arith.sitofp %34 : vector<8x8xi32> to vector<8x8xf32>
    %36 = vector.shape_cast %35 : vector<8x8xf32> to vector<1x8x8xf32>
    %37 = vector.broadcast %36 : vector<1x8x8xf32> to vector<8x8x8xf32>
    %38 = arith.mulf %29, %37 : vector<8x8x8xf32>
    %39 = vector.shape_cast %2 : vector<8x8xf32> to vector<8x1x8xf32>
    %40 = vector.broadcast %39 : vector<8x1x8xf32> to vector<8x8x8xf32>
    %41 = arith.mulf %38, %40 : vector<8x8x8xf32>
    %cst_16 = arith.constant dense<0.000000e+00> : vector<8x8xf32>
    %42 = vector.multi_reduction <add>, %41, %cst_16 [2] : vector<8x8x8xf32> to vector<8x8xf32>
    %43 = arith.mulf %42, %2 : vector<8x8xf32>
    %cst_17 = arith.constant dense<0xFF800000> : vector<8xf32>
    %44 = vector.multi_reduction <maximumf>, %43, %cst_17 [1] : vector<8x8xf32> to vector<8xf32>
    %45 = vector.shape_cast %44 : vector<8xf32> to vector<8x1xf32>
    %46 = vector.broadcast %45 : vector<8x1xf32> to vector<8x8xf32>
    %47 = arith.subf %43, %46 : vector<8x8xf32>
    %48 = math.exp %47 : vector<8x8xf32>
    %cst_18 = arith.constant dense<0.000000e+00> : vector<8xf32>
    %49 = vector.multi_reduction <add>, %48, %cst_18 [1] : vector<8x8xf32> to vector<8xf32>
    %50 = vector.shape_cast %49 : vector<8xf32> to vector<8x1xf32>
    %cst_19 = arith.constant 9.99999971E-10 : f32
    %51 = vector.broadcast %cst_19 : f32 to vector<8x1xf32>
    %52 = arith.maximumf %50, %51 : vector<8x1xf32>
    %53 = tpu.reciprocal %52 {approx = true} : vector<8x1xf32> -> vector<8x1xf32>
    %54 = vector.broadcast %53 : vector<8x1xf32> to vector<8x8xf32>
    %55 = arith.mulf %48, %54 : vector<8x8xf32>
    %56 = arith.mulf %55, %2 : vector<8x8xf32>
    %cst_20 = arith.constant dense<0.000000e+00> : vector<8xf32>
    %57 = vector.multi_reduction <add>, %56, %cst_20 [1] : vector<8x8xf32> to vector<8xf32>
    %58 = vector.shape_cast %57 : vector<8xf32> to vector<8x1xf32>
    %cst_21 = arith.constant 9.99999971E-10 : f32
    %59 = vector.broadcast %cst_21 : f32 to vector<8x1xf32>
    %60 = arith.maximumf %58, %59 : vector<8x1xf32>
    %61 = tpu.reciprocal %60 {approx = true} : vector<8x1xf32> -> vector<8x1xf32>
    %62 = vector.broadcast %61 : vector<8x1xf32> to vector<8x8xf32>
    %63 = arith.mulf %56, %62 : vector<8x8xf32>
    %64 = vector.shape_cast %63 : vector<8x8xf32> to vector<8x8x1xf32>
    %65 = vector.broadcast %64 : vector<8x8x1xf32> to vector<8x8x128xf32>
    %66 = arith.mulf %65, %1 : vector<8x8x128xf32>
    %cst_22 = arith.constant dense<0.000000e+00> : vector<8x128xf32>
    %67 = vector.multi_reduction <add>, %66, %cst_22 [1] : vector<8x8x128xf32> to vector<8x128xf32>
    %c0_23 = arith.constant 0 : index
    %c0_24 = arith.constant 0 : index
    %68 = vector.load %arg6[%c0_23, %c0_24] : memref<128x128xf32, #tpu.memory_space<vmem>>, vector<128x128xf32>
    %cst_25 = arith.constant dense<0.000000e+00> : vector<8x128xf32>
    %69 = tpu.matmul %67, %68, %cst_25 {dimension_numbers = #tpu.dot_dimension_numbers<[1], [0], [0], [1], [0, 0, 1, 1], [], []>} : vector<8x128xf32>, vector<128x128xf32>, vector<8x128xf32> -> vector<8x128xf32>
    %c0_26 = arith.constant 0 : index
    %c0_27 = arith.constant 0 : index
    %70 = vector.load %arg2[%c0_26, %c0_27] : memref<8x128xbf16, #tpu.memory_space<vmem>>, vector<8x128xbf16>
    %71 = arith.extf %70 : vector<8x128xbf16> to vector<8x128xf32>
    %c0_28 = arith.constant 0 : index
    %c0_29 = arith.constant 0 : index
    %72 = vector.load %arg7[%c0_28, %c0_29] : memref<128x128xf32, #tpu.memory_space<vmem>>, vector<128x128xf32>
    %cst_30 = arith.constant dense<0.000000e+00> : vector<8x128xf32>
    %73 = tpu.matmul %71, %72, %cst_30 {dimension_numbers = #tpu.dot_dimension_numbers<[1], [0], [0], [1], [0, 0, 1, 1], [], []>} : vector<8x128xf32>, vector<128x128xf32>, vector<8x128xf32> -> vector<8x128xf32>
    %74 = arith.addf %69, %73 : vector<8x128xf32>
    %c0_31 = arith.constant 0 : index
    %c0_32 = arith.constant 0 : index
    %75 = vector.load %arg8[%c0_31, %c0_32] : memref<1x128xf32, #tpu.memory_space<vmem>>, vector<1x128xf32>
    %76 = vector.broadcast %75 : vector<1x128xf32> to vector<8x128xf32>
    %77 = arith.addf %74, %76 : vector<8x128xf32>
    %78 = arith.truncf %77 : vector<8x128xf32> to vector<8x128xbf16>
    %c0_33 = arith.constant 0 : index
    %c0_34 = arith.constant 0 : index
    %79 = vector.load %arg9[%c0_33, %c0_34] : memref<8x128xbf16, #tpu.memory_space<vmem>>, vector<8x128xbf16>
    tpu.vector_store %arg9[%c0_33, %c0_34], %78 {strides = array<i32>} : memref<8x128xbf16, #tpu.memory_space<vmem>>, vector<8x128xbf16>,
    return
  }
  func.func @transform_0(%arg0: i32) -> (i32, i32, i32) {
    %c0_i32 = arith.constant 0 : i32
    %c0_i32_0 = arith.constant 0 : i32
    %c0_i32_1 = arith.constant 0 : i32
    return %arg0, %c0_i32, %c0_i32_0 : i32, i32, i32
  }
  func.func @transform_1(%arg0: i32) -> (i32, i32) {
    %c0_i32 = arith.constant 0 : i32
    %c0_i32_0 = arith.constant 0 : i32
    return %arg0, %c0_i32 : i32, i32
  }
  func.func @transform_2(%arg0: i32) -> (i32, i32) {
    %c0_i32 = arith.constant 0 : i32
    %c0_i32_0 = arith.constant 0 : i32
    return %arg0, %c0_i32 : i32, i32
  }
  func.func @transform_3(%arg0: i32) -> (i32, i32) {
    %c0_i32 = arith.constant 0 : i32
    %c0_i32_0 = arith.constant 0 : i32
    %c0_i32_1 = arith.constant 0 : i32
    return %c0_i32, %c0_i32_0 : i32, i32
  }
  func.func @transform_4(%arg0: i32) -> (i32, i32) {
    %c0_i32 = arith.constant 0 : i32
    %c0_i32_0 = arith.constant 0 : i32
    %c0_i32_1 = arith.constant 0 : i32
    return %c0_i32, %c0_i32_0 : i32, i32
  }
  func.func @transform_5(%arg0: i32) -> (i32, i32) {
    %c0_i32 = arith.constant 0 : i32
    %c0_i32_0 = arith.constant 0 : i32
    %c0_i32_1 = arith.constant 0 : i32
    return %c0_i32, %c0_i32_0 : i32, i32
  }
  func.func @transform_6(%arg0: i32) -> (i32, i32) {
    %c0_i32 = arith.constant 0 : i32
    %c0_i32_0 = arith.constant 0 : i32
    %c0_i32_1 = arith.constant 0 : i32
    return %c0_i32, %c0_i32_0 : i32, i32
  }
  func.func @transform_7(%arg0: i32) -> (i32, i32) {
    %c0_i32 = arith.constant 0 : i32
    %c0_i32_0 = arith.constant 0 : i32
    %c0_i32_1 = arith.constant 0 : i32
    return %c0_i32, %c0_i32_0 : i32, i32
  }
  func.func @transform_8(%arg0: i32) -> (i32, i32) {
    %c0_i32 = arith.constant 0 : i32
    %c0_i32_0 = arith.constant 0 : i32
    return %arg0, %c0_i32 : i32, i32
  }
  func.func @transform_9(%arg0: i32) -> (i32, i32, i32) {
    %c0_i32 = arith.constant 0 : i32
    %c0_i32_0 = arith.constant 0 : i32
    %c0_i32_1 = arith.constant 0 : i32
    return %arg0, %c0_i32, %c0_i32_0 : i32, i32, i32
  }
}

</mosaic_0001>

<bundles_post_ra>
// kernel: tpu_custom_call.1
= control target key start
LH: loop header
LB: loop body
LE: loop exit
PB: predicated region body
PF: predicated region fallthrough
CT: control target
= control target key end

     0   :  { %15 = vsyncpa [#allocation3], 0  ;;  %s3092_s0 = inlined_call_operand.hbm [shape: bf16[8,8,128], index: 0, kind: input, shape index: {}]   ;;  %s3093_s1 = inlined_call_operand.hbm [shape: bf16[8,128], index: 1, kind: input, shape index: {}]   ;;  %s3094_s2 = inlined_call_operand.hbm [shape: f32[8,8], index: 2, kind: input, shape index: {}]   ;;  %s3095_s3 = inlined_call_operand.hbm [shape: f32[128,128], index: 3, kind: input, shape index: {}]   ;;  %s3096_s4 = inlined_call_operand.hbm [shape: f32[128,128], index: 4, kind: input, shape index: {}]   ;;  %s3097_s5 = inlined_call_operand.hbm [shape: f32[128,128], index: 5, kind: input, shape index: {}]   ;;  %s3098_s6 = inlined_call_operand.hbm [shape: f32[128,128], index: 6, kind: input, shape index: {}]   ;;  %s3099_s7 = inlined_call_operand.vmem [shape: f32[1,128], index: 7, kind: input, shape index: {}]   ;;  %s3100_s8 = inlined_call_operand.hbm [shape: bf16[8,128], index: 8, kind: output, shape index: {0}]   ;;  %s3101_s9 = inlined_call_operand.hbm [shape: f32[8,8,8], index: 9, kind: output, shape index: {1}]  }
   0x1   :  { %16 = vsyncpa [#allocation6], 0 }
   0x2   :  { %17 = vsyncpa [#allocation9], 0 }
   0x3   :  { %18 = vsyncpa [#allocation12], 0 }
   0x4   :  { %19 = vsyncpa [#allocation4], 0 }
   0x5   :  { %20 = vsyncpa [#allocation16], 0  ;;  %s2642_s30 = smov [#allocation5]   ;;  %s2643_s11 = smov [#allocation8]  }
   0x6   :  { %s39_s10 = sshll.u32 %s2642_s30, 4  ;;  %s58_s12 = sshll.u32 %s2643_s11, 4  ;;  %s40_s10 = int_to_ptr.vmem [resolvable:$true] %s39_s10  ;;  %s59_s12 = int_to_ptr.vmem [resolvable:$true] %s58_s12 }
   0x7   :  { %s2458_s13 = scalar_lea.vmem %s40_s10, 64  ;;  %p2463_p1 = scmp.lt.s32.totalorder %s40_s10, %s40_s10 }
   0x8   :  { %p2459_p0 = scmp.ne.s32.totalorder %s40_s10, %s2458_s13  ;;  %p2464_p2 = scmp.lt.s32.totalorder %s2458_s13, %s2458_s13 }
   0xa   :  { %p2465_p3 = por %p2464_p2, %p2463_p1 }
   0xc   :  { %p2466_p4 = pnand %p2465_p3, %p2459_p0 }
   0xe   :  { %2469 = shalt.err (!%p2466_p4)
}
   0xf   :  { %42 = dma.hbm_to_vmem [thread:$0]  %s3093_s1, 64, %s40_s10, [#allocation6]  }
  0x10   :  { %s2478_s16 = scalar_lea.vmem %s59_s12, 2048  ;;  %p2483_p6 = scmp.lt.s32.totalorder %s59_s12, %s59_s12 }
  0x11   :  { %p2479_p5 = scmp.ne.s32.totalorder %s59_s12, %s2478_s16  ;;  %p2484_p7 = scmp.lt.s32.totalorder %s2478_s16, %s2478_s16 }
  0x13   :  { %p2485_p8 = por %p2484_p7, %p2483_p6 }
  0x15   :  { %p2486_p9 = pnand %p2485_p8, %p2479_p5 }
  0x17   :  { %2489 = shalt.err (!%p2486_p9)
}
  0x18   :  { %s2644_s17 = smov 128   ;;  %s2645_s18 = smov 8  }
  0x19   :  { %64 = dma.hbm_to_vmem [thread:$0]  %s3095_s3, 2048, %s59_s12, [#allocation9], %s2644_s17, %s2644_s17, %s2645_s18  }
  0x1a   :  { %s2646_s21 = smov [#allocation11]   ;;  %s2647_s23 = smov [#allocation2]  }
  0x1b   :  { %s82_s22 = sshll.u32 %s2646_s21, 4  ;;  %s26_s1 = sshll.u32 %s2647_s23, 4  ;;  %s83_s22 = int_to_ptr.vmem [resolvable:$true] %s82_s22  ;;  %s27_s1 = int_to_ptr.vmem [resolvable:$true] %s26_s1 }
  0x1c   :  { %s2498_s24 = scalar_lea.vmem %s83_s22, 2048  ;;  %p2503_p11 = scmp.lt.s32.totalorder %s83_s22, %s83_s22 }
  0x1d   :  { %p2499_p10 = scmp.ne.s32.totalorder %s83_s22, %s2498_s24  ;;  %p2504_p12 = scmp.lt.s32.totalorder %s2498_s24, %s2498_s24 }
  0x1f   :  { %p2505_p13 = por %p2504_p12, %p2503_p11 }
  0x21   :  { %p2506_p0 = pnand %p2505_p13, %p2499_p10 }
  0x23   :  { %2509 = shalt.err (!%p2506_p0)
}
  0x24   :  { %88 = dma.hbm_to_vmem [thread:$0]  %s3097_s5, 2048, %s83_s22, [#allocation12], %s2644_s17, %s2644_s17, %s2645_s18  }
  0x25   :  { %s2518_s3 = scalar_lea.vmem %s27_s1, 512  ;;  %p2523_p2 = scmp.lt.s32.totalorder %s27_s1, %s27_s1 }
  0x26   :  { %p2519_p1 = scmp.ne.s32.totalorder %s27_s1, %s2518_s3  ;;  %p2524_p3 = scmp.lt.s32.totalorder %s2518_s3, %s2518_s3 }
  0x28   :  { %p2525_p4 = por %p2524_p3, %p2523_p2 }
  0x2a   :  { %p2526_p5 = pnand %p2525_p4, %p2519_p1 }
  0x2c   :  { %2529 = shalt.err (!%p2526_p5)
}
  0x2d   :  { %s2648_s27 = smov 64   ;;  %s2649_s28 = smov 4  }
  0x2e   :  { %32 = dma.hbm_to_vmem [thread:$0]  %s3092_s0, 512, %s27_s1, [#allocation3], %s2648_s27, %s2648_s27, %s2649_s28  }
  0x2f   :  { %s2650_s10 = smov [#allocation7]   ;;  %s2651_s12 = smov [#allocation10]  }
  0x30   :  { %s49_s11 = sshll.u32 %s2650_s10, 4  ;;  %s70_s13 = sshll.u32 %s2651_s12, 4  ;;  %s50_s11 = int_to_ptr.vmem [resolvable:$true] %s49_s11  ;;  %s71_s13 = int_to_ptr.vmem [resolvable:$true] %s70_s13 }
  0x31   :  { %s2538_s5 = scalar_lea.vmem %s50_s11, 128  ;;  %p2543_p7 = scmp.lt.s32.totalorder %s50_s11, %s50_s11 }
  0x32   :  { %p2539_p6 = scmp.ne.s32.totalorder %s50_s11, %s2538_s5  ;;  %p2544_p8 = scmp.lt.s32.totalorder %s2538_s5, %s2538_s5 }
  0x34   :  { %p2545_p9 = por %p2544_p8, %p2543_p7 }
  0x36   :  { %p2546_p10 = pnand %p2545_p9, %p2539_p6 }
  0x38   :  { %2549 = shalt.err (!%p2546_p10)
}
  0x39   :  { %52 = dma.hbm_to_vmem [thread:$0]  %s3094_s2, 128, %s50_s11, [#allocation6]  }
  0x3a   :  { %s2558_s16 = scalar_lea.vmem %s71_s13, 2048  ;;  %p2563_p12 = scmp.lt.s32.totalorder %s71_s13, %s71_s13 }
  0x3b   :  { %p2559_p11 = scmp.ne.s32.totalorder %s71_s13, %s2558_s16  ;;  %p2564_p13 = scmp.lt.s32.totalorder %s2558_s16, %s2558_s16 }
  0x3d   :  { %p2565_p0 = por %p2564_p13, %p2563_p12 }
  0x3f   :  { %p2566_p1 = pnand %p2565_p0, %p2559_p11 }
  0x41   :  { %2569 = shalt.err (!%p2566_p1)
}
  0x42   :  { %76 = dma.hbm_to_vmem [thread:$0]  %s3096_s4, 2048, %s71_s13, [#allocation9], %s2644_s17, %s2644_s17, %s2645_s18  }
  0x43   :  { %s2652_s20 = smov [#allocation13]  }
  0x44   :  { %s94_s21 = sshll.u32 %s2652_s20, 4  ;;  %s95_s21 = int_to_ptr.vmem [resolvable:$true] %s94_s21 }
  0x45   :  { %s2578_s22 = scalar_lea.vmem %s95_s21, 2048  ;;  %p2583_p3 = scmp.lt.s32.totalorder %s95_s21, %s95_s21 }
  0x46   :  { %p2579_p2 = scmp.ne.s32.totalorder %s95_s21, %s2578_s22  ;;  %p2584_p4 = scmp.lt.s32.totalorder %s2578_s22, %s2578_s22 }
  0x48   :  { %p2585_p5 = por %p2584_p4, %p2583_p3 }
  0x4a   :  { %p2586_p6 = pnand %p2585_p5, %p2579_p2 }
  0x4c   :  { %2589 = shalt.err (!%p2586_p6)
}
  0x4d   :  { %100 = dma.hbm_to_vmem [thread:$0]  %s3098_s6, 2048, %s95_s21, [#allocation12], %s2644_s17, %s2644_s17, %s2645_s18  }
  0x4e   :  { %2630 = dma.done.wait [#allocation3], 512  }
  0x4f   :  { %2631 = vsyncadd [#allocation3], 4294966784 }
  0x50   :  { %2632 = dma.done.wait [#allocation6], 192  }
  0x51   :  { %2633 = vsyncadd [#allocation6], 4294967104 }
  0x52   :  { %2634 = dma.done.wait [#allocation9], 4096  }
  0x53   :  { %2635 = vsyncadd [#allocation9], 4294963200 }
  0x54   :  { %2636 = dma.done.wait [#allocation12], 4096  }
  0x55   :  { %2637 = vsyncadd [#allocation12], 4294963200  ;;  %v325_v0 = vld [vmem:[#allocation10 + $0x78] sm:$0xff]  ;;  %v324_v1 = vld [vmem:[#allocation10 + $0x70] sm:$0xff]  ;;  %v2653_v44 = vmov 0.0   ;;  %vm2654_vm0 = vmmov 0   ;;  %v479_v45 = vlaneseq }
  0x56   :  { %2193 = vmatprep.subr.mxu1 %v325_v0  ;;  %v156_v2 = vld [vmem:[#allocation8 + $0x78] sm:$0xff]  ;;  %v155_v3 = vld [vmem:[#allocation8 + $0x70] sm:$0xff]  ;;  %v323_v4 = vld [vmem:[#allocation10 + $0x68] sm:$0xff]  ;;  %vm1060_vm3 = vcmask 64512   ;;  %vm1340_vm4 = vcmask 1041409   ;;  %vm1342_vm5 = vcmask 1042434  }
  0x57   :  { %2194 = vmatpush3.msra.mxu1 %v325_v0  ;;  %2149 = vmatprep.subr.mxu0 %v156_v2  ;;  %v154_v5 = vld [vmem:[#allocation8 + $0x68] sm:$0xff]  ;;  %v322_v6 = vld [vmem:[#allocation10 + $0x60] sm:$0xff]  ;;  %v321_v8 = vld [vmem:[#allocation10 + $0x58] sm:$0xff]  ;;  %v2781_v46 = vshrl.u32 %v479_v45, 7  ;;  %vm1344_vm6 = vcmask 1043459   ;;  %vm1346_vm7 = vcmask 1044484  }
  0x58   :  { %2195 = vmatprep.subr.mxu1 %v324_v1  ;;  %2150 = vmatpush3.msra.mxu0 %v156_v2  ;;  %v153_v7 = vld [vmem:[#allocation8 + $0x60] sm:$0xff]  ;;  %v152_v9 = vld [vmem:[#allocation8 + $0x58] sm:$0xff]  ;;  %v320_v10 = vld [vmem:[#allocation10 + $0x50] sm:$0xff]  ;;  %vm1348_vm8 = vcmask 1045509   ;;  %vm1350_vm9 = vcmask 1046534   ;;  %vm1352_vm10 = vcmask 1047559  }
  0x59   :  { %2196 = vmatpush3.msra.mxu1 %v324_v1  ;;  %2151 = vmatprep.subr.mxu0 %v155_v3  ;;  %v151_v11 = vld [vmem:[#allocation8 + $0x50] sm:$0xff]  ;;  %v319_v12 = vld [vmem:[#allocation10 + $0x48] sm:$0xff]  ;;  %v318_v14 = vld [vmem:[#allocation10 + $0x40] sm:$0xff]  ;;  %v2786_v48 = vsub.s32 1, %v2781_v46  ;;  %v2789_v49 = vsub.s32 2, %v2781_v46  ;;  %v2792_v50 = vsub.s32 0, %v2781_v46 }
  0x5a   :  { %2197 = vmatprep.subr.mxu1 %v323_v4  ;;  %2152 = vmatpush3.msra.mxu0 %v155_v3  ;;  %v150_v13 = vld [vmem:[#allocation8 + $0x48] sm:$0xff]  ;;  %v149_v15 = vld [vmem:[#allocation8 + $0x40] sm:$0xff]  ;;  %v317_v16 = vld [vmem:[#allocation10 + $0x38] sm:$0xff]  ;;  %v2795_v51 = vsub.s32 4, %v2781_v46  ;;  %v2804_v55 = vsub.s32 3, %v2781_v46  ;;  %v2811_v58 = vsub.s32 5, %v2781_v46 }
  0x5b   :  { %2198 = vmatpush3.msra.mxu1 %v323_v4  ;;  %2153 = vmatprep.subr.mxu0 %v154_v5  ;;  %v148_v17 = vld [vmem:[#allocation8 + $0x38] sm:$0xff]  ;;  %v316_v18 = vld [vmem:[#allocation10 + $0x30] sm:$0xff]  ;;  %v315_v20 = vld [vmem:[#allocation10 + $0x28] sm:$0xff]  ;;  %s2657_s4 = smov [#allocation15]  }
  0x5c   :  { %2199 = vmatprep.subr.mxu1 %v322_v6  ;;  %2154 = vmatpush3.msra.mxu0 %v154_v5  ;;  %v147_v19 = vld [vmem:[#allocation8 + $0x30] sm:$0xff]  ;;  %v146_v21 = vld [vmem:[#allocation8 + $0x28] sm:$0xff]  ;;  %v314_v22 = vld [vmem:[#allocation10 + $0x20] sm:$0xff]  ;;  %s1994_s6 = sshll.u32 %s2657_s4, 4  ;;  %s1995_s6 = int_to_ptr.vmem [resolvable:$true] %s1994_s6 }
  0x5d   :  { %2200 = vmatpush3.msra.mxu1 %v322_v6  ;;  %2155 = vmatprep.subr.mxu0 %v153_v7  ;;  %v145_v23 = vld [vmem:[#allocation8 + $0x20] sm:$0xff]  ;;  %v313_v24 = vld [vmem:[#allocation10 + $0x18] sm:$0xff]  ;;  %v312_v27 = vld [vmem:[#allocation10 + $0x10] sm:$0xff]  ;;  %s2590_s1 = scalar_lea.vmem %s1995_s6, 1024  ;;  %p2595_p8 = scmp.lt.s32.totalorder %s1995_s6, %s1995_s6 }
  0x5e   :  { %2201 = vmatprep.subr.mxu1 %v321_v8  ;;  %2156 = vmatpush3.msra.mxu0 %v153_v7  ;;  %v2033_v25 = vld [vmem:[#allocation2] sm:$0xff]   ;;  %v311_v30 = vld [vmem:[#allocation10 + $0x8] sm:$0xff]  ;;  %v2048_v31 = vld [vmem:[#allocation2 + $0x8] sm:$0xff]   ;;  %p2591_p7 = scmp.ne.s32.totalorder %s1995_s6, %s2590_s1  ;;  %p2596_p9 = scmp.lt.s32.totalorder %s2590_s1, %s2590_s1 }
  0x5f   :  { %2202 = vmatpush3.msra.mxu1 %v321_v8  ;;  %2157 = vmatprep.subr.mxu0 %v152_v9  ;;  %v144_v26 = vld [vmem:[#allocation8 + $0x18] sm:$0xff]  ;;  %v143_v28 = vld [vmem:[#allocation8 + $0x10] sm:$0xff]  ;;  %v2742_v29 = vunpack.c.l.bf16 %v2033_v25  ;;  %v310_v32 = vld [vmem:[#allocation10] sm:$0xff]  ;;  %v2745_v34 = vunpack.c.h.bf16 %v2033_v25  ;;  %v2747_v36 = vunpack.c.l.bf16 %v2048_v31  ;;  %v2750_v38 = vunpack.c.h.bf16 %v2048_v31 }
  0x60   :  { %2203 = vmatprep.subr.mxu1 %v320_v10  ;;  %2158 = vmatpush3.msra.mxu0 %v152_v9  ;;  %v142_v33 = vld [vmem:[#allocation8 + $0x8] sm:$0xff]  ;;  %v141_v35 = vld [vmem:[#allocation8] sm:$0xff]  ;;  %v2783_v47 = vld [vmem:[#allocation7] sm:$0xff]  ;;  %p2597_p10 = por %p2596_p9, %p2595_p8 }
  0x61   :  { %2204 = vmatpush3.msra.mxu1 %v320_v10  ;;  %2159 = vmatprep.subr.mxu0 %v151_v11  ;;  %v2049_v37 = vld [vmem:[#allocation2 + $0x10] sm:$0xff]   ;;  %v2050_v40 = vld [vmem:[#allocation2 + $0x18] sm:$0xff]   ;;  %v1214_v52 = vrot.slane %v2783_v47, %v2786_v48  ;;  %v1207_v53 = vrot.slane %v2783_v47, %v2792_v50  ;;  %v1221_v54 = vrot.slane %v2783_v47, %v2789_v49 }
  0x62   :  { %2205 = vmatprep.subr.mxu1 %v319_v12  ;;  %2160 = vmatpush3.msra.mxu0 %v151_v11  ;;  %v2753_v39 = vunpack.c.l.bf16 %v2049_v37  ;;  %v2759_v41 = vunpack.c.h.bf16 %v2049_v37  ;;  %v2762_v42 = vunpack.c.l.bf16 %v2050_v40  ;;  %v2767_v43 = vunpack.c.h.bf16 %v2050_v40  ;;  %p2598_p11 = pnand %p2597_p10, %p2591_p7 }
  0x63   :  { %2206 = vmatpush3.msra.mxu1 %v319_v12  ;;  %2161 = vmatprep.subr.mxu0 %v150_v13  ;;  %v1235_v56 = vrot.slane %v2783_v47, %v2795_v51  ;;  %v1228_v57 = vrot.slane %v2783_v47, %v2804_v55  ;;  %v1242_v59 = vrot.slane %v2783_v47, %v2811_v58 }
  0x64   :  { %2207 = vmatprep.subr.mxu1 %v318_v14  ;;  %2162 = vmatpush3.msra.mxu0 %v150_v13 }
  0x65   :  { %2208 = vmatpush3.msra.mxu1 %v318_v14  ;;  %2163 = vmatprep.subr.mxu0 %v149_v15 }
  0x66   :  { %2209 = vmatprep.subr.mxu1 %v317_v16  ;;  %2164 = vmatpush3.msra.mxu0 %v149_v15 }
  0x67   :  { %2210 = vmatpush3.msra.mxu1 %v317_v16  ;;  %2165 = vmatprep.subr.mxu0 %v148_v17 }
  0x68   :  { %2211 = vmatprep.subr.mxu1 %v316_v18  ;;  %2166 = vmatpush3.msra.mxu0 %v148_v17 }
  0x69   :  { %2212 = vmatpush3.msra.mxu1 %v316_v18  ;;  %2167 = vmatprep.subr.mxu0 %v147_v19 }
  0x6a   :  { %2213 = vmatprep.subr.mxu1 %v315_v20  ;;  %2168 = vmatpush3.msra.mxu0 %v147_v19 }
  0x6b   :  { %2214 = vmatpush3.msra.mxu1 %v315_v20  ;;  %2169 = vmatprep.subr.mxu0 %v146_v21 }
  0x6c   :  { %2215 = vmatprep.subr.mxu1 %v314_v22  ;;  %2170 = vmatpush3.msra.mxu0 %v146_v21 }
  0x6d   :  { %2216 = vmatpush3.msra.mxu1 %v314_v22  ;;  %2171 = vmatprep.subr.mxu0 %v145_v23 }
  0x6e   :  { %2217 = vmatprep.subr.mxu1 %v313_v24  ;;  %2172 = vmatpush3.msra.mxu0 %v145_v23 }
  0x6f   :  { %2218 = vmatpush3.msra.mxu1 %v313_v24  ;;  %2173 = vmatprep.subr.mxu0 %v144_v26 }
  0x70   :  { %2219 = vmatprep.subr.mxu1 %v312_v27  ;;  %2174 = vmatpush3.msra.mxu0 %v144_v26 }
  0x71   :  { %2220 = vmatpush3.msra.mxu1 %v312_v27  ;;  %2175 = vmatprep.subr.mxu0 %v143_v28 }
  0x72   :  { %2221 = vmatprep.subr.mxu1 %v311_v30  ;;  %2225 = vmatprep.mubr.f32.mxu1 %v2742_v29 }
  0x73   :  { %2222 = vmatpush3.msra.mxu1 %v311_v30  ;;  %2176 = vmatpush3.msra.mxu0 %v143_v28 }
  0x74   :  { %2223 = vmatprep.subr.mxu1 %v310_v32  ;;  %2177 = vmatprep.subr.mxu0 %v142_v33 }
  0x75   :  { %2224 = vmatpush3.msra.mxu1 %v310_v32  ;;  %2178 = vmatpush3.msra.mxu0 %v142_v33 }
  0x76   :  { %2226 = vmatmul.mubr.f32.vlgmr.msra.gmra.mxu1 %v2745_v34  ;;  %2179 = vmatprep.subr.mxu0 %v141_v35 }
  0x77   :  { %2228 = vmatprep.mubr.f32.mxu1 %v2747_v36  ;;  %2180 = vmatpush3.msra.mxu0 %v141_v35 }
  0x78   :  { %2181 = vmatprep.mubr.f32.mxu0 %v2742_v29  ;;  %2242 = vmatprep.subr.mxu1 %v2653_v44 }
  0x79   :  { %2182 = vmatmul.mubr.f32.vlgmr.msra.gmra.mxu0 %v2745_v34  ;;  %2237 = vmatprep.subr.mxu0 %v2653_v44 }
  0x7a   :  { %2229 = vmatmul.mubr.f32.gmra.mxu1 %v2750_v38  ;;  %2184 = vmatprep.mubr.f32.mxu0 %v2747_v36 }
  0x7b   :  { %2231 = vmatprep.mubr.f32.mxu1 %v2753_v39  ;;  %1216 = vbcast.lane.b32.xlu1 %v1214_v52, 256 }
  0x7c   :  { %1209 = vbcast.lane.b32.xlu0 %v1207_v53, 256 }
  0x7d   :  { %2185 = vmatmul.mubr.f32.gmra.mxu0 %v2750_v38 }
  0x7e   :  { %2232 = vmatmul.mubr.f32.gmra.mxu1 %v2759_v41  ;;  %2187 = vmatprep.mubr.f32.mxu0 %v2753_v39 }
  0x7f   :  { %2234 = vmatprep.mubr.f32.mxu1 %v2762_v42  ;;  %1223 = vbcast.lane.b32.xlu1 %v1221_v54, 256 }
  0x80   :  { %1237 = vbcast.lane.b32.xlu0 %v1235_v56, 256 }
  0x81   :  { %2188 = vmatmul.mubr.f32.gmra.mxu0 %v2759_v41 }
  0x82   :  { %2235 = vmatmul.mubr.f32.gmra.mxu1 %v2767_v43  ;;  %2190 = vmatprep.mubr.f32.mxu0 %v2762_v42 }
  0x83   :  { %2244 = vmatprep.mubr.msk.f32.mxu1 %vm2654_vm0, %v2653_v44  ;;  %1230 = vbcast.lane.b32.xlu1 %v1228_v57, 256 }
  0x85   :  { %2191 = vmatmul.mubr.f32.gmra.mxu0 %v2767_v43 }
  0x86   :  { %2239 = vmatprep.mubr.msk.f32.mxu0 %vm2654_vm0, %v2653_v44 }
  0x87   :  { %1244 = vbcast.lane.b32.xlu1 %v1242_v59, 256  ;;  %v2816_v59 = vand.u32 127, %v479_v45 }
  0x89   :  { %vm481_vm1 = vcmp.lt.s32.totalorder %v2816_v59, 100  ;;  %vm1071_vm2 = vcmp.ne.s32.totalorder %v2781_v46, %v2816_v59 }
 0x136   :  { %v2227_v60 = vpop.f32.mrf.mxu1 }
 0x137   :  { %v2022_v61 = vmul.f32 -1.442695, %v2227_v60 }
 0x138   :  { %v392_v62 = vpop.f32.mrf.mxu1 }
 0x139   :  { %2366 = vpow2.f32 %v2022_v61  ;;  %v2021_v63 = vmul.f32 -1.442695, %v392_v62  ;;  %v2183_v0 = vpop.f32.mrf.mxu0 }
 0x13a   :  { %v2230_v1 = vpop.f32.mrf.mxu1  ;;  %v2014_v2 = vmul.f32 -1.442695, %v2183_v0 }
 0x13b   :  { %2368 = vpow2.f32 %v2021_v63  ;;  %v2024_v3 = vmul.f32 -1.442695, %v2230_v1  ;;  %v223_v4 = vpop.f32.mrf.mxu0 }
 0x13c   :  { %2370 = vpow2.f32 %v2014_v2  ;;  %v402_v5 = vpop.f32.mrf.mxu1  ;;  %v2013_v6 = vmul.f32 -1.442695, %v223_v4 }
 0x13d   :  { %2372 = vpow2.f32 %v2024_v3  ;;  %v2023_v7 = vmul.f32 -1.442695, %v402_v5  ;;  %v2186_v8 = vpop.f32.mrf.mxu0 }
 0x13e   :  { %2374 = vpow2.f32 %v2013_v6  ;;  %v2233_v9 = vpop.f32.mrf.mxu1  ;;  %v2016_v10 = vmul.f32 -1.442695, %v2186_v8 }
 0x13f   :  { %2376 = vpow2.f32 %v2023_v7  ;;  %v2026_v11 = vmul.f32 -1.442695, %v2233_v9  ;;  %v233_v12 = vpop.f32.mrf.mxu0  ;;  %v2029_v9 = vsel %vm481_vm1, 1.0, %v2653_v44 }
 0x140   :  { %2378 = vpow2.f32 %v2016_v10  ;;  %v412_v13 = vpop.f32.mrf.mxu1  ;;  %v2015_v14 = vmul.f32 -1.442695, %v233_v12 }
 0x141   :  { %2380 = vpow2.f32 %v2026_v11  ;;  %v2025_v15 = vmul.f32 -1.442695, %v412_v13  ;;  %v2189_v16 = vpop.f32.mrf.mxu0 }
 0x142   :  { %2382 = vpow2.f32 %v2015_v14  ;;  %v2236_v17 = vpop.f32.mrf.mxu1  ;;  %v2018_v18 = vmul.f32 -1.442695, %v2189_v16 }
 0x143   :  { %2384 = vpow2.f32 %v2025_v15  ;;  %v2028_v19 = vmul.f32 -1.442695, %v2236_v17  ;;  %v243_v20 = vpop.f32.mrf.mxu0 }
 0x144   :  { %2386 = vpow2.f32 %v2018_v18  ;;  %v422_v21 = vpop.f32.mrf.mxu1  ;;  %v2017_v22 = vmul.f32 -1.442695, %v243_v20 }
 0x145   :  { %2388 = vpow2.f32 %v2028_v19  ;;  %v2027_v23 = vmul.f32 -1.442695, %v422_v21  ;;  %v2192_v24 = vpop.f32.mrf.mxu0 }
 0x146   :  { %v2367_v25 = vpop.eup %2366  ;;  %2390 = vpow2.f32 %v2017_v22  ;;  %v2020_v26 = vmul.f32 -1.442695, %v2192_v24 }
 0x147   :  { %v456_v27 = vadd.f32 1.0, %v2367_v25  ;;  %2392 = vpow2.f32 %v2027_v23  ;;  %v253_v28 = vpop.f32.mrf.mxu0 }
 0x148   :  { %v2369_v30 = vpop.eup %2368  ;;  %2394 = vpow2.f32 %v2020_v26  ;;  %v2019_v31 = vmul.f32 -1.442695, %v253_v28 }
 0x149   :  { %v2371_v32 = vpop.eup %2370  ;;  %2396 = vrcp.f32 %v456_v27  ;;  %v455_v33 = vadd.f32 1.0, %v2369_v30 }
 0x14a   :  { %v2373_v35 = vpop.eup %2372  ;;  %v287_v37 = vadd.f32 1.0, %v2371_v32  ;;  %2398 = vpow2.f32 %v2019_v31 }
 0x14b   :  { %v2375_v40 = vpop.eup %2374  ;;  %2400 = vrcp.f32 %v455_v33  ;;  %v458_v52 = vadd.f32 1.0, %v2373_v35 }
 0x14c   :  { %v2377_v53 = vpop.eup %2376  ;;  %2402 = vrcp.f32 %v287_v37  ;;  %v286_v54 = vadd.f32 1.0, %v2375_v40 }
 0x14d   :  { %v2379_v56 = vpop.eup %2378  ;;  %2404 = vrcp.f32 %v458_v52  ;;  %v457_v57 = vadd.f32 1.0, %v2377_v53 }
 0x14e   :  { %v2381_v60 = vpop.eup %2380  ;;  %2406 = vrcp.f32 %v286_v54  ;;  %v289_v61 = vadd.f32 1.0, %v2379_v56  ;;  %v2655_v56 = vmov 1966171168  }
 0x14f   :  { %v2383_v62 = vpop.eup %2382  ;;  %2408 = vrcp.f32 %v457_v57  ;;  %v460_v63 = vadd.f32 1.0, %v2381_v60  ;;  %v1085_v57 = vunpack.c.l.s4 %v2655_v56 }
 0x150   :  { %v2385_v0 = vpop.eup %2384  ;;  %2410 = vrcp.f32 %v289_v61  ;;  %v288_v1 = vadd.f32 1.0, %v2383_v62 }
 0x151   :  { %v2387_v2 = vpop.eup %2386  ;;  %2412 = vrcp.f32 %v460_v63  ;;  %v459_v3 = vadd.f32 1.0, %v2385_v0  ;;  %v1086_v60 = vunpack.c.0.s8 %v1085_v57  ;;  %v1083_v0 = vcombine.high %v2783_v47, %v2783_v47 }
 0x152   :  { %v2389_v4 = vpop.eup %2388  ;;  %2414 = vrcp.f32 %v288_v1  ;;  %v291_v5 = vadd.f32 1.0, %v2387_v2 }
 0x153   :  { %v2391_v6 = vpop.eup %2390  ;;  %2416 = vrcp.f32 %v459_v3  ;;  %v462_v45 = vadd.f32 1.0, %v2389_v4  ;;  %v1089_v61 = vsub.s32 %v1086_v60, %v2781_v46 }
 0x154   :  { %v2393_v7 = vpop.eup %2392  ;;  %2418 = vrcp.f32 %v291_v5  ;;  %v290_v8 = vadd.f32 1.0, %v2391_v6  ;;  %v2851_v5 = vsel %vm1071_vm2, 1.0, %v2653_v44 }
 0x155   :  { %v2395_v10 = vpop.eup %2394  ;;  %2420 = vrcp.f32 %v462_v45  ;;  %v461_v11 = vadd.f32 1.0, %v2393_v7  ;;  %v1090_v62 = vrot.slane %v2783_v47, %v1089_v61  ;;  %v1097_v2 = vrot.slane %v1083_v0, %v1089_v61 }
 0x156   :  { %v2397_v12 = vpop.eup %2396  ;;  %2422 = vrcp.f32 %v290_v8  ;;  %v293_v13 = vadd.f32 1.0, %v2395_v10 }
 0x157   :  { %v2399_v14 = vpop.eup %2398  ;;  %2424 = vrcp.f32 %v461_v11  ;;  %v485_v15 = vmul.f32 %v2397_v12, %v2029_v9  ;;  %v1098_v63 = vcombine.high %v1090_v62, %v1090_v62  ;;  %v1106_v3 = vrot.slane %v1090_v62, %v1089_v61 }
 0x158   :  { %v2401_v16 = vpop.eup %2400  ;;  %2426 = vrcp.f32 %v293_v13  ;;  %v292_v17 = vadd.f32 1.0, %v2399_v14  ;;  %v1099_v8 = vcombine.high %v1097_v2, %v1097_v2 }
 0x159   :  { %v2403_v18 = vpop.eup %2402  ;;  %2243 = vmatpush3.xpose.msra.mxu1 %v485_v15  ;;  %v484_v19 = vmul.f32 %v2401_v16, %v2029_v9  ;;  %v1120_v1 = vrot.slane %v1098_v63, %v1089_v61  ;;  %v1128_v11 = vcombine.high %v1106_v3, %v1106_v3  ;;  %v1135_v14 = vrot.slane %v1106_v3, %v2792_v50 }
 0x15a   :  { %v2405_v20 = vpop.eup %2404  ;;  %2428 = vrcp.f32 %v292_v17  ;;  %2252 = vmatprep.subr.mxu1 %v2653_v44 }
 0x15b   :  { %v2407_v21 = vpop.eup %2406  ;;  %2238 = vmatpush3.xpose.msra.mxu0 %v484_v19  ;;  %v487_v22 = vmul.f32 %v2405_v20, %v2029_v9  ;;  %v1130_v6 = vcombine.high %v1120_v1, %v1120_v1  ;;  %v1139_v7 = vrot.slane %v1120_v1, %v2792_v50 }
 0x15c   :  { %v2409_v23 = vpop.eup %2408  ;;  %2245 = vmatmul.mubr.f32.vlgmr.msra.gmra.mxu1 %v2403_v18  ;;  %2247 = vmatprep.subr.mxu0 %v2653_v44 }
 0x15d   :  { %v2411_v24 = vpop.eup %2410  ;;  %2253 = vmatpush3.xpose.msra.mxu1 %v487_v22  ;;  %v486_v25 = vmul.f32 %v2409_v23, %v2029_v9  ;;  %2254 = vmatprep.mubr.msk.f32.mxu1 %vm2654_vm0, %v2653_v44  ;;  %v1147_v17 = vrot.slane %v1130_v6, %v2792_v50 }
 0x15e   :  { %v2413_v26 = vpop.eup %2412  ;;  %2240 = vmatmul.mubr.f32.vlgmr.msra.gmra.mxu0 %v2407_v21  ;;  %2262 = vmatprep.subr.mxu1 %v2653_v44  ;;  %v1127_v21 = vrot.slane %v1099_v8, %v1089_v61 }
 0x15f   :  { %v2415_v27 = vpop.eup %2414  ;;  %2248 = vmatpush3.xpose.msra.mxu0 %v486_v25  ;;  %2249 = vmatprep.mubr.msk.f32.mxu0 %vm2654_vm0, %v2653_v44  ;;  %v489_v28 = vmul.f32 %v2413_v26, %v2029_v9  ;;  %v1113_v25 = vrot.slane %v1097_v2, %v1089_v61 }
 0x160   :  { %v2417_v30 = vpop.eup %2416  ;;  %2255 = vmatmul.mubr.f32.vlgmr.msra.gmra.mxu1 %v2411_v24  ;;  %2257 = vmatprep.subr.mxu0 %v2653_v44  ;;  %v1143_v24 = vrot.slane %v1128_v11, %v2792_v50  ;;  %v1131_v60 = vcombine.high %v1127_v21, %v1127_v21 }
 0x161   :  { %v2419_v31 = vpop.eup %2418  ;;  %v488_v32 = vmul.f32 %v2417_v30, %v2029_v9  ;;  %2263 = vmatpush3.xpose.msra.mxu1 %v489_v28  ;;  %2264 = vmatprep.mubr.msk.f32.mxu1 %vm2654_vm0, %v2653_v44  ;;  %v1151_v56 = vrot.slane %v1113_v25, %v2792_v50  ;;  %v1129_v57 = vcombine.high %v1113_v25, %v1113_v25 }
 0x162   :  { %v2421_v33 = vpop.eup %2420  ;;  %2250 = vmatmul.mubr.f32.vlgmr.msra.gmra.mxu0 %v2415_v27  ;;  %2272 = vmatprep.subr.mxu1 %v2653_v44  ;;  %v1163_v8 = vrot.slane %v1131_v60, %v2792_v50 }
 0x163   :  { %v2423_v35 = vpop.eup %2422  ;;  %2258 = vmatpush3.xpose.msra.mxu0 %v488_v32  ;;  %2259 = vmatprep.mubr.msk.f32.mxu0 %vm2654_vm0, %v2653_v44  ;;  %v491_v37 = vmul.f32 %v2421_v33, %v2029_v9 }
 0x164   :  { %v2425_v40 = vpop.eup %2424  ;;  %2267 = vmatprep.subr.mxu0 %v2653_v44  ;;  %2265 = vmatmul.mubr.f32.vlgmr.msra.gmra.mxu1 %v2419_v31 }
 0x165   :  { %v2427_v52 = vpop.eup %2426  ;;  %v490_v53 = vmul.f32 %v2425_v40, %v2029_v9  ;;  %2273 = vmatpush3.xpose.msra.mxu1 %v491_v37  ;;  %2274 = vmatprep.mubr.msk.f32.mxu1 %vm2654_vm0, %v2653_v44  ;;  %v1155_v40 = vrot.slane %v1127_v21, %v2792_v50 }
 0x166   :  { %2260 = vmatmul.mubr.f32.vlgmr.msra.gmra.mxu0 %v2423_v35  ;;  %2312 = vmatprep.subr.mxu1 %v2653_v44 }
 0x167   :  { %v2429_v54 = vpop.eup %2428  ;;  %2268 = vmatpush3.xpose.msra.mxu0 %v490_v53  ;;  %2269 = vmatprep.mubr.msk.f32.mxu0 %vm2654_vm0, %v2653_v44 }
 0x168   :  { %2275 = vmatmul.mubr.f32.vlgmr.msra.gmra.mxu1 %v2427_v52  ;;  %2277 = vmatprep.subr.mxu0 %v2653_v44 }
 0x169   :  { %2344 = vmatprep.mubr.msk.f32.mxu1 %vm2654_vm0, %v2653_v44 }
 0x16a   :  { %2270 = vmatmul.mubr.f32.vlgmr.msra.gmra.mxu0 %v2429_v54 }
 0x16b   :  { %2309 = vmatprep.mubr.msk.f32.mxu0 %vm2654_vm0, %v2653_v44 }
 0x21c   :  { %v628_v4 = vpop.f32.mrf.mxu1 }
 0x21d   :  { %v1053_v45 = vmul.f32 0.1, %v628_v4 }
 0x21e   :  { %v558_v9 = vpop.f32.mrf.mxu0  ;;  %v2246_v10 = vpop.f32.mrf.mxu1 }
 0x21f   :  { %1062 = vst.msk [vmem:[#allocation15 + $0x8] sm:$0xff] %vm1060_vm3, %v1053_v45  ;;  %v1075_v12 = vmul.f32 %v2851_v5, %v1053_v45  ;;  %v1052_v13 = vmul.f32 0.1, %v558_v9 }
 0x220   :  { %v2241_v15 = vpop.f32.mrf.mxu0  ;;  %v768_v16 = vpop.f32.mrf.mxu1 }
 0x221   :  { %1061 = vst.msk [vmem:[#allocation15] sm:$0xff] %vm1060_vm3, %v1052_v13  ;;  %v1074_v18 = vmul.f32 %v2851_v5, %v1052_v13  ;;  %v1055_v19 = vmul.f32 0.1, %v768_v16  ;;  %v1173_v20 = vmul.f32 %v1139_v7, %v1075_v12  ;;  %v1159_v7 = vrot.slane %v1129_v57, %v2792_v50 }
 0x222   :  { %v698_v22 = vpop.f32.mrf.mxu0  ;;  %v2256_v23 = vpop.f32.mrf.mxu1 }
 0x223   :  { %1064 = vst.msk [vmem:[#allocation15 + $0x18] sm:$0xff] %vm1060_vm3, %v1055_v19  ;;  %v1077_v26 = vmul.f32 %v2851_v5, %v1055_v19  ;;  %v1054_v27 = vmul.f32 0.1, %v698_v22  ;;  %v1183_v28 = vsel %vm1060_vm3, %v1173_v20, 0.0  ;;  %v1172_v30 = vmul.f32 %v1135_v14, %v1074_v18 }
 0x224   :  { %1184 = vadd.xlane.f32.xlu0 %v1183_v28  ;;  %v2251_v31 = vpop.f32.mrf.mxu0  ;;  %v908_v32 = vpop.f32.mrf.mxu1  ;;  %v2656_v20 = vmov 0   ;;  %v2886_v23 = vsub.s32 7, %v2781_v46 }
 0x225   :  { %1063 = vst.msk [vmem:[#allocation15 + $0x10] sm:$0xff] %vm1060_vm3, %v1054_v27  ;;  %v1076_v33 = vmul.f32 %v2851_v5, %v1054_v27  ;;  %v1175_v35 = vmul.f32 %v1147_v17, %v1077_v26  ;;  %v1057_v37 = vmul.f32 0.1, %v908_v32  ;;  %v1180_v53 = vsel %vm1060_vm3, %v1172_v30, 0.0  ;;  %2364 = vset.pattern.permute.xlu1 %v2656_v20  ;;  %2365 = vset.pattern.permute.xlu0 %v2656_v20  ;;  %v2895_v26 = vpop.permute.xlu1 %1216  ;;  %v2899_v28 = vpop.permute.xlu0 %1209 }
 0x226   :  { %v838_v52 = vpop.f32.mrf.mxu0  ;;  %v2266_v54 = vpop.f32.mrf.mxu1 }
 0x227   :  { %v1056_v61 = vmul.f32 0.1, %v838_v52  ;;  %v1189_v62 = vsel %vm1060_vm3, %v1175_v35, 0.0  ;;  %1066 = vst.msk [vmem:[#allocation15 + $0x28] sm:$0xff] %vm1060_vm3, %v1057_v37  ;;  %v1079_v63 = vmul.f32 %v2851_v5, %v1057_v37  ;;  %v1174_v0 = vmul.f32 %v1143_v24, %v1076_v33 }
 0x228   :  { %1190 = vadd.xlane.f32.xlu1 %v1189_v62  ;;  %1181 = vadd.xlane.f32.xlu0 %v1180_v53  ;;  %v2261_v1 = vpop.f32.mrf.mxu0  ;;  %v1048_v2 = vpop.f32.mrf.mxu1  ;;  %v1256_v24 = vrot.slane %v2783_v47, %v2886_v23 }
 0x229   :  { %1065 = vst.msk [vmem:[#allocation15 + $0x20] sm:$0xff] %vm1060_vm3, %v1056_v61  ;;  %v1078_v3 = vmul.f32 %v2851_v5, %v1056_v61  ;;  %v1059_v4 = vmul.f32 0.1, %v1048_v2  ;;  %v1186_v45 = vsel %vm1060_vm3, %v1174_v0, 0.0  ;;  %v1177_v13 = vmul.f32 %v1155_v40, %v1079_v63  ;;  %v2897_v27 = vpop.permute.xlu1 %1223  ;;  %v2903_v31 = vpop.permute.xlu0 %1237 }
 0x22a   :  { %v978_v6 = vpop.f32.mrf.mxu0  ;;  %v2276_v9 = vpop.f32.mrf.mxu1 }
 0x22b   :  { %v1058_v10 = vmul.f32 0.1, %v978_v6  ;;  %1068 = vst.msk [vmem:[#allocation15 + $0x38] sm:$0xff] %vm1060_vm3, %v1059_v4  ;;  %v1081_v11 = vmul.f32 %v2851_v5, %v1059_v4  ;;  %v1176_v12 = vmul.f32 %v1151_v56, %v1078_v3  ;;  %v1195_v17 = vsel %vm1060_vm3, %v1177_v13, 0.0 }
 0x22c   :  { %1187 = vadd.xlane.f32.xlu1 %v1186_v45  ;;  %v2271_v14 = vpop.f32.mrf.mxu0  ;;  %v2936_v45 = vsub.s32 %v2816_v59, %v2781_v46 }
 0x22d   :  { %1067 = vst.msk [vmem:[#allocation15 + $0x30] sm:$0xff] %vm1060_vm3, %v1058_v10  ;;  %v1080_v15 = vmul.f32 %v2851_v5, %v1058_v10  ;;  %v1192_v16 = vsel %vm1060_vm3, %v1176_v12, 0.0  ;;  %v1179_v19 = vmul.f32 %v1163_v8, %v1081_v11  ;;  %v2889_v5 = vsub.s32 6, %v2781_v46  ;;  %v2901_v30 = vpop.permute.xlu1 %1230 }
 0x22e   :  { %1193 = vadd.xlane.f32.xlu0 %v1192_v16 }
 0x22f   :  { %v1178_v18 = vmul.f32 %v1159_v7, %v1080_v15  ;;  %v1201_v22 = vsel %vm1060_vm3, %v1179_v19, 0.0  ;;  %v1249_v25 = vrot.slane %v2783_v47, %v2889_v5 }
 0x230   :  { %1196 = vadd.xlane.f32.xlu1 %v1195_v17 }
 0x231   :  { %v1198_v21 = vsel %vm1060_vm3, %v1178_v18, 0.0  ;;  %v2905_v32 = vpop.permute.xlu1 %1244 }
 0x232   :  { %1199 = vadd.xlane.f32.xlu0 %v1198_v21 }
 0x234   :  { %1202 = vadd.xlane.f32.xlu1 %v1201_v22 }
 0x245   :  { %1258 = vbcast.lane.b32.xlu1 %v1256_v24, 256 }
 0x248   :  { %1251 = vbcast.lane.b32.xlu0 %v1249_v25, 256 }
 0x2ad   :  { %v1185_v33 = vpop.xlane.xlu0 %1184 }
 0x2ae   :  { %v2908_v35 = vmul.f32 %v2895_v26, %v1185_v33 }
 0x2b0   :  { %1288 = vperm.xlu1 %2364, %v2908_v35  }
 0x2b1   :  { %v1191_v47 = vpop.xlane.xlu1 %1190  ;;  %v1182_v37 = vpop.xlane.xlu0 %1181 }
 0x2b2   :  { %v1268_v40 = vmul.f32 %v2899_v28, %v1182_v37  ;;  %v2913_v53 = vmul.f32 %v2901_v30, %v1191_v47 }
 0x2b4   :  { %1285 = vperm.xlu0 %2365, %v1268_v40  }
 0x2b5   :  { %v1188_v52 = vpop.xlane.xlu1 %1187 }
 0x2b6   :  { %v1270_v54 = vmul.f32 %v2897_v27, %v1188_v52 }
 0x2b7   :  { %v1194_v56 = vpop.xlane.xlu0 %1193 }
 0x2b8   :  { %1291 = vperm.xlu1 %2364, %v1270_v54   ;;  %1294 = vperm.xlu0 %2365, %v2913_v53   ;;  %v1272_v60 = vmul.f32 %v2903_v31, %v1194_v56 }
 0x2b9   :  { %v1197_v57 = vpop.xlane.xlu1 %1196 }
 0x2ba   :  { %v2919_v61 = vmul.f32 %v2905_v32, %v1197_v57 }
 0x2bb   :  { %v1200_v62 = vpop.xlane.xlu0 %1199 }
 0x2bc   :  { %1297 = vperm.xlu1 %2364, %v1272_v60   ;;  %1300 = vperm.xlu0 %2365, %v2919_v61  }
 0x2bd   :  { %v1203_v63 = vpop.xlane.xlu1 %1202 }
 0x2bf   :  { %v2922_v0 = vpop.permute.xlu0 %1251 }
 0x2c0   :  { %v2925_v1 = vmul.f32 %v2922_v0, %v1200_v62 }
 0x2c1   :  { %v2927_v2 = vpop.permute.xlu1 %1258 }
 0x2c2   :  { %v2930_v3 = vmul.f32 %v2927_v2, %v1203_v63  ;;  %1303 = vperm.xlu1 %2364, %v2925_v1  }
 0x2c4   :  { %1306 = vperm.xlu0 %2365, %v2930_v3  }
 0x32b   :  { %v1289_v4 = vpop.permute.xlu1 %1288 }
 0x32c   :  { %v1315_v11 = vrot.slane %v1289_v4, %v2936_v45 }
 0x32f   :  { %v1286_v6 = vpop.permute.xlu0 %1285 }
 0x330   :  { %v1311_v7 = vrot.slane %v1286_v6, %v2936_v45 }
 0x332   :  { %v1341_v12 = vsel %vm1340_vm4, %v1315_v11, %v1311_v7 }
 0x333   :  { %v1292_v8 = vpop.permute.xlu1 %1291  ;;  %v1295_v9 = vpop.permute.xlu0 %1294 }
 0x334   :  { %v1319_v10 = vrot.slane %v1292_v8, %v2936_v45  ;;  %v1323_v13 = vrot.slane %v1295_v9, %v2936_v45 }
 0x336   :  { %v1343_v15 = vsel %vm1342_vm5, %v1319_v10, %v1341_v12 }
 0x337   :  { %v1298_v14 = vpop.permute.xlu1 %1297  ;;  %v1301_v59 = vpop.permute.xlu0 %1300  ;;  %v1345_v16 = vsel %vm1344_vm6, %v1323_v13, %v1343_v15 }
 0x338   :  { %v1327_v46 = vrot.slane %v1298_v14, %v2936_v45  ;;  %v1331_v17 = vrot.slane %v1301_v59, %v2936_v45 }
 0x33a   :  { %v1347_v18 = vsel %vm1346_vm7, %v1327_v46, %v1345_v16 }
 0x33b   :  { %v1349_v21 = vsel %vm1348_vm8, %v1331_v17, %v1347_v18 }
 0x33d   :  { %v1304_v19 = vpop.permute.xlu1 %1303 }
 0x33e   :  { %v1335_v20 = vrot.slane %v1304_v19, %v2936_v45 }
 0x33f   :  { %v1307_v22 = vpop.permute.xlu0 %1306 }
 0x340   :  { %v1339_v24 = vrot.slane %v1307_v22, %v2936_v45  ;;  %v1351_v25 = vsel %vm1350_vm9, %v1335_v20, %v1349_v21 }
 0x342   :  { %v1353_v33 = vsel %vm1352_vm10, %v1339_v24, %v1351_v25 }
 0x343   :  { %v1355_v47 = vsel %vm1060_vm3, %v1353_v33, -inf }
 0x344   :  { %1356 = vmax.xlane.f32.xlu1 %v1355_v47 }
 0x3cd   :  { %v1357_v37 = vpop.xlane.xlu1 %1356 }
 0x3ce   :  { %v1362_v52 = vrot.slane %v1357_v37, %v2792_v50  ;;  %v1366_v56 = vrot.slane %v1357_v37, %v2786_v48  ;;  %v1370_v57 = vrot.slane %v1357_v37, %v2789_v49  ;;  %v1374_v6 = vrot.slane %v1357_v37, %v2804_v55 }
 0x3cf   :  { %v1378_v9 = vrot.slane %v1357_v37, %v2795_v51  ;;  %v1382_v12 = vrot.slane %v1357_v37, %v2811_v58  ;;  %v1390_v46 = vrot.slane %v1357_v37, %v2886_v23 }
 0x3d0   :  { %v1399_v62 = vsub.f32 %v1268_v40, %v1362_v52  ;;  %v1400_v63 = vsub.f32 %v2908_v35, %v1366_v56  ;;  %v1401_v7 = vsub.f32 %v1270_v54, %v1370_v57  ;;  %v1402_v10 = vsub.f32 %v2913_v53, %v1374_v6 }
 0x3d1   :  { %v1403_v13 = vsub.f32 %v1272_v60, %v1378_v9  ;;  %v1386_v40 = vrot.slane %v1357_v37, %v2889_v5  ;;  %v1404_v35 = vsub.f32 %v2919_v61, %v1382_v12  ;;  %v1406_v60 = vsub.f32 %v2930_v3, %v1390_v46 }
 0x3d2   :  { %v1407_v4 = vmul.f32 1.442695, %v1399_v62  ;;  %v1409_v8 = vmul.f32 1.442695, %v1400_v63  ;;  %v1411_v11 = vmul.f32 1.442695, %v1401_v7 }
 0x3d3   :  { %v1413_v14 = vmul.f32 1.442695, %v1402_v10  ;;  %v1415_v15 = vmul.f32 1.442695, %v1403_v13  ;;  %v1405_v59 = vsub.f32 %v2925_v1, %v1386_v40  ;;  %v1417_v53 = vmul.f32 1.442695, %v1404_v35 }
 0x3d4   :  { %2430 = vpow2.f32 %v1407_v4  ;;  %v1421_v61 = vmul.f32 1.442695, %v1406_v60 }
 0x3d5   :  { %2432 = vpow2.f32 %v1409_v8  ;;  %v1419_v17 = vmul.f32 1.442695, %v1405_v59 }
 0x3d6   :  { %2434 = vpow2.f32 %v1411_v11 }
 0x3d7   :  { %2436 = vpow2.f32 %v1413_v14 }
 0x3d8   :  { %2438 = vpow2.f32 %v1415_v15 }
 0x3d9   :  { %2440 = vpow2.f32 %v1417_v53 }
 0x3da   :  { %2442 = vpow2.f32 %v1419_v17 }
 0x3db   :  { %2444 = vpow2.f32 %v1421_v61 }
 0x3e1   :  { %v2431_v54 = vpop.eup %2430 }
 0x3e2   :  { %1432 = vperm.xlu0 %2365, %v2431_v54   ;;  %v2433_v16 = vpop.eup %2432 }
 0x3e3   :  { %v2435_v18 = vpop.eup %2434 }
 0x3e4   :  { %v2437_v19 = vpop.eup %2436 }
 0x3e5   :  { %v2439_v20 = vpop.eup %2438 }
 0x3e6   :  { %1435 = vperm.xlu0 %2365, %v2433_v16   ;;  %v2441_v21 = vpop.eup %2440 }
 0x3e7   :  { %v2443_v1 = vpop.eup %2442 }
 0x3e8   :  { %v2445_v22 = vpop.eup %2444 }
 0x3ea   :  { %1438 = vperm.xlu0 %2365, %v2435_v18  }
 0x3ee   :  { %1441 = vperm.xlu0 %2365, %v2437_v19  }
 0x3f2   :  { %1444 = vperm.xlu0 %2365, %v2439_v20  }
 0x3f6   :  { %1447 = vperm.xlu0 %2365, %v2441_v21  }
 0x3fa   :  { %1450 = vperm.xlu0 %2365, %v2443_v1  }
 0x3fe   :  { %1453 = vperm.xlu0 %2365, %v2445_v22  }
 0x45d   :  { %v1433_v24 = vpop.permute.xlu0 %1432 }
 0x45e   :  { %v1458_v57 = vrot.slane %v1433_v24, %v2936_v45 }
 0x461   :  { %v1436_v25 = vpop.permute.xlu0 %1435 }
 0x462   :  { %v1462_v52 = vrot.slane %v1436_v25, %v2936_v45 }
 0x464   :  { %v1487_v6 = vsel %vm1340_vm4, %v1462_v52, %v1458_v57 }
 0x465   :  { %v1439_v3 = vpop.permute.xlu0 %1438 }
 0x466   :  { %v1466_v56 = vrot.slane %v1439_v3, %v2936_v45 }
 0x468   :  { %v1488_v8 = vsel %vm1342_vm5, %v1466_v56, %v1487_v6 }
 0x469   :  { %v1442_v33 = vpop.permute.xlu0 %1441 }
 0x46a   :  { %v1470_v62 = vrot.slane %v1442_v33, %v2936_v45 }
 0x46c   :  { %v1489_v10 = vsel %vm1344_vm6, %v1470_v62, %v1488_v8 }
 0x46d   :  { %v1445_v47 = vpop.permute.xlu0 %1444 }
 0x46e   :  { %v1474_v63 = vrot.slane %v1445_v47, %v2936_v45 }
 0x470   :  { %v1490_v11 = vsel %vm1346_vm7, %v1474_v63, %v1489_v10 }
 0x471   :  { %v1448_v37 = vpop.permute.xlu0 %1447 }
 0x472   :  { %v1478_v7 = vrot.slane %v1448_v37, %v2936_v45 }
 0x474   :  { %v1491_v13 = vsel %vm1348_vm8, %v1478_v7, %v1490_v11 }
 0x475   :  { %v1451_v4 = vpop.permute.xlu0 %1450 }
 0x476   :  { %v1482_v9 = vrot.slane %v1451_v4, %v2936_v45 }
 0x478   :  { %v1492_v40 = vsel %vm1350_vm9, %v1482_v9, %v1491_v13 }
 0x479   :  { %v1454_v12 = vpop.permute.xlu0 %1453 }
 0x47a   :  { %v1486_v14 = vrot.slane %v1454_v12, %v2936_v45 }
 0x47c   :  { %v1493_v35 = vsel %vm1352_vm10, %v1486_v14, %v1492_v40 }
 0x47d   :  { %v1495_v15 = vsel %vm1060_vm3, %v1493_v35, 0.0 }
 0x47e   :  { %1496 = vadd.xlane.f32.xlu0 %v1495_v15 }
 0x507   :  { %v1497_v46 = vpop.xlane.xlu0 %1496 }
 0x508   :  { %v1498_v59 = vmax.f32 %v1497_v46, 1e-09 }
 0x50a   :  { %2446 = vrcp.f32 %v1498_v59 }
 0x517   :  { %v2447_v53 = vpop.eup %2446 }
 0x518   :  { %v1520_v60 = vrot.slane %v2447_v53, %v2795_v51  ;;  %v1504_v17 = vrot.slane %v2447_v53, %v2792_v50  ;;  %v1508_v61 = vrot.slane %v2447_v53, %v2786_v48  ;;  %v1512_v37 = vrot.slane %v2447_v53, %v2789_v49 }
 0x519   :  { %v1516_v57 = vrot.slane %v2447_v53, %v2804_v55  ;;  %v1528_v62 = vrot.slane %v2447_v53, %v2889_v5 }
 0x51a   :  { %v1545_v24 = vmul.f32 %v2439_v20, %v1520_v60  ;;  %v1541_v25 = vmul.f32 %v2431_v54, %v1504_v17  ;;  %v1542_v47 = vmul.f32 %v2433_v16, %v1508_v61  ;;  %v1543_v56 = vmul.f32 %v2435_v18, %v1512_v37 }
 0x51b   :  { %v1544_v54 = vmul.f32 %v2437_v19, %v1516_v57  ;;  %v1532_v18 = vrot.slane %v2447_v53, %v2886_v23 }
 0x51c   :  { %v2987_v3 = vmul.f32 %v1545_v24, %v2903_v31  ;;  %v1549_v33 = vmul.f32 %v1541_v25, %v2899_v28  ;;  %v1550_v52 = vmul.f32 %v1542_v47, %v2895_v26  ;;  %v1551_v20 = vmul.f32 %v1543_v56, %v2897_v27 }
 0x51d   :  { %v1524_v31 = vrot.slane %v2447_v53, %v2811_v58  ;;  %v1552_v28 = vmul.f32 %v1544_v54, %v2901_v30  ;;  %v1547_v26 = vmul.f32 %v2443_v1, %v1528_v62  ;;  %v1548_v19 = vmul.f32 %v2445_v22, %v1532_v18 }
 0x51e   :  { %1578 = vperm.xlu0 %2365, %v2987_v3   ;;  %1566 = vperm.xlu1 %2364, %v1549_v33  }
 0x51f   :  { %v1546_v16 = vmul.f32 %v2441_v21, %v1524_v31  ;;  %v3004_v27 = vmul.f32 %v1547_v26, %v2922_v0  ;;  %v1556_v30 = vmul.f32 %v1548_v19, %v2927_v2  ;;  %v1812_v26 = vld [vmem:[#allocation13 + $0x78] sm:$0xff] }
 0x520   :  { %2278 = vmatpush3.msra.mxu0 %v1812_v26  ;;  %v1808_v19 = vld [vmem:[#allocation13 + $0x58] sm:$0xff] }
 0x521   :  { %v2999_v63 = vmul.f32 %v1546_v16, %v2905_v32  ;;  %2279 = vmatprep.subr.mxu0 %v2653_v44 }
 0x522   :  { %1569 = vperm.xlu1 %2364, %v1550_v52  }
 0x526   :  { %1572 = vperm.xlu1 %2364, %v1551_v20  }
 0x52a   :  { %1575 = vperm.xlu1 %2364, %v1552_v28  }
 0x52e   :  { %1581 = vperm.xlu1 %2364, %v2999_v63  }
 0x532   :  { %1584 = vperm.xlu1 %2364, %v3004_v27  }
 0x536   :  { %1587 = vperm.xlu1 %2364, %v1556_v30  }
 0x599   :  { %v1567_v21 = vpop.permute.xlu1 %1566  ;;  %v1579_v10 = vpop.permute.xlu0 %1578 }
 0x59a   :  { %v1592_v9 = vrot.slane %v1567_v21, %v2936_v45  ;;  %v1608_v14 = vrot.slane %v1579_v10, %v2936_v45  ;;  %v1807_v21 = vld [vmem:[#allocation13 + $0x50] sm:$0xff]  ;;  %v1784_v10 = vld [vmem:[#allocation11 + $0x28] sm:$0xff] }
 0x59d   :  { %v1570_v4 = vpop.permute.xlu1 %1569 }
 0x59e   :  { %v1596_v32 = vrot.slane %v1570_v4, %v2936_v45  ;;  %v1789_v4 = vld [vmem:[#allocation11 + $0x50] sm:$0xff] }
 0x5a0   :  { %v1621_v22 = vsel %vm1340_vm4, %v1596_v32, %v1592_v9  ;;  %v1787_v32 = vld [vmem:[#allocation11 + $0x40] sm:$0xff]  ;;  %v1785_v9 = vld [vmem:[#allocation11 + $0x30] sm:$0xff] }
 0x5a1   :  { %v1573_v6 = vpop.permute.xlu1 %1572 }
 0x5a2   :  { %v1600_v1 = vrot.slane %v1573_v6, %v2936_v45 }
 0x5a4   :  { %v1622_v11 = vsel %vm1342_vm5, %v1600_v1, %v1621_v22  ;;  %v1786_v1 = vld [vmem:[#allocation11 + $0x38] sm:$0xff]  ;;  %v1801_v22 = vld [vmem:[#allocation13 + $0x20] sm:$0xff] }
 0x5a5   :  { %v1576_v7 = vpop.permute.xlu1 %1575 }
 0x5a6   :  { %v1604_v0 = vrot.slane %v1576_v7, %v2936_v45  ;;  %v1805_v7 = vld [vmem:[#allocation13 + $0x40] sm:$0xff] }
 0x5a8   :  { %v1623_v12 = vsel %vm1344_vm6, %v1604_v0, %v1622_v11  ;;  %v1802_v0 = vld [vmem:[#allocation13 + $0x28] sm:$0xff]  ;;  %v1783_v11 = vld [vmem:[#allocation11 + $0x20] sm:$0xff] }
 0x5a9   :  { %v1582_v8 = vpop.permute.xlu1 %1581  ;;  %v1624_v35 = vsel %vm1346_vm7, %v1608_v14, %v1623_v12  ;;  %v1782_v12 = vld [vmem:[#allocation11 + $0x18] sm:$0xff]  ;;  %v1781_v14 = vld [vmem:[#allocation11 + $0x10] sm:$0xff] }
 0x5aa   :  { %v1612_v13 = vrot.slane %v1582_v8, %v2936_v45  ;;  %v1803_v8 = vld [vmem:[#allocation13 + $0x30] sm:$0xff] }
 0x5ac   :  { %v1625_v46 = vsel %vm1348_vm8, %v1612_v13, %v1624_v35  ;;  %v1799_v13 = vld [vmem:[#allocation13 + $0x10] sm:$0xff]  ;;  %v1798_v35 = vld [vmem:[#allocation13 + $0x8] sm:$0xff] }
 0x5ad   :  { %v1585_v2 = vpop.permute.xlu1 %1584 }
 0x5ae   :  { %v1616_v40 = vrot.slane %v1585_v2, %v2936_v45  ;;  %v1800_v2 = vld [vmem:[#allocation13 + $0x18] sm:$0xff] }
 0x5b0   :  { %v1626_v53 = vsel %vm1350_vm9, %v1616_v40, %v1625_v46  ;;  %v1795_v40 = vld [vmem:[#allocation5] sm:$0xf]  ;;  %v1797_v46 = vld [vmem:[#allocation13] sm:$0xff] }
 0x5b1   :  { %v1588_v15 = vpop.permute.xlu1 %1587 }
 0x5b2   :  { %v1620_v59 = vrot.slane %v1588_v15, %v2936_v45  ;;  %v1780_v15 = vld [vmem:[#allocation11 + $0x8] sm:$0xff] }
 0x5b4   :  { %v1627_v60 = vsel %vm1352_vm10, %v1620_v59, %v1626_v53  ;;  %v1779_v59 = vld [vmem:[#allocation11] sm:$0xff]  ;;  %v1796_v53 = vunpack.c.l.bf16 %v1795_v40 }
 0x5b5   :  { %v1629_v17 = vsel %vm1060_vm3, %v1627_v60, 0.0 }
 0x5b6   :  { %1630 = vadd.xlane.f32.xlu1 %v1629_v17 }
 0x63f   :  { %v1631_v61 = vpop.xlane.xlu1 %1630 }
 0x640   :  { %v1632_v24 = vmax.f32 %v1631_v61, 1e-09 }
 0x642   :  { %2448 = vrcp.f32 %v1632_v24 }
 0x64f   :  { %v2449_v25 = vpop.eup %2448 }
 0x650   :  { %v1666_v47 = vrot.slane %v2449_v25, %v2886_v23  ;;  %v1638_v37 = vrot.slane %v2449_v25, %v2792_v50  ;;  %v1642_v54 = vrot.slane %v2449_v25, %v2786_v48  ;;  %v1646_v31 = vrot.slane %v2449_v25, %v2789_v49  ;;  %v1794_v50 = vld [vmem:[#allocation11 + $0x78] sm:$0xff]  ;;  %v1793_v48 = vld [vmem:[#allocation11 + $0x70] sm:$0xff]  ;;  %v1810_v49 = vld [vmem:[#allocation13 + $0x68] sm:$0xff] }
 0x651   :  { %v1650_v62 = vrot.slane %v2449_v25, %v2804_v55  ;;  %v1654_v23 = vrot.slane %v2449_v25, %v2795_v51  ;;  %2313 = vmatpush3.msra.mxu1 %v1794_v50  ;;  %v1658_v55 = vrot.slane %v2449_v25, %v2811_v58  ;;  %v1792_v51 = vld [vmem:[#allocation11 + $0x68] sm:$0xff]  ;;  %v1662_v58 = vrot.slane %v2449_v25, %v2889_v5 }
 0x652   :  { %v1682_v56 = vmul.f32 %v1666_v47, %v1556_v30  ;;  %v1675_v57 = vmul.f32 %v1638_v37, %v1549_v33  ;;  %v1676_v45 = vmul.f32 %v1642_v54, %v1550_v52  ;;  %v1677_v16 = vmul.f32 %v1646_v31, %v1551_v20  ;;  %v1811_v33 = vld [vmem:[#allocation13 + $0x70] sm:$0xff]  ;;  %2314 = vmatprep.subr.mxu1 %v2653_v44  ;;  %v1809_v20 = vld [vmem:[#allocation13 + $0x60] sm:$0xff]  ;;  %v1790_v30 = vld [vmem:[#allocation11 + $0x58] sm:$0xff] }
 0x653   :  { %v1678_v18 = vmul.f32 %v1650_v62, %v1552_v28  ;;  %2280 = vmatpush3.msra.mxu0 %v1811_v33  ;;  %v1679_v52 = vmul.f32 %v1654_v23, %v2987_v3  ;;  %2315 = vmatpush3.msra.mxu1 %v1793_v48  ;;  %v1791_v28 = vld [vmem:[#allocation11 + $0x60] sm:$0xff]  ;;  %v1680_v3 = vmul.f32 %v1658_v55, %v2999_v63  ;;  %v1806_v5 = vld [vmem:[#allocation13 + $0x48] sm:$0xff] }
 0x654   :  { %1720 = vperm.xlu1 %2364, %v1682_v56   ;;  %1685 = vperm.xlu0 %2365, %v1675_v57   ;;  %v1681_v6 = vmul.f32 %v1662_v58, %v3004_v27  ;;  %v1788_v63 = vld [vmem:[#allocation11 + $0x48] sm:$0xff]  ;;  %v1804_v27 = vld [vmem:[#allocation13 + $0x38] sm:$0xff] }
 0x655   :  { %2281 = vmatprep.subr.mxu0 %v2653_v44  ;;  %2316 = vmatprep.subr.mxu1 %v2653_v44 }
 0x656   :  { %2282 = vmatpush3.msra.mxu0 %v1810_v49  ;;  %2317 = vmatpush3.msra.mxu1 %v1792_v51 }
 0x657   :  { %2283 = vmatprep.subr.mxu0 %v2653_v44  ;;  %2318 = vmatprep.subr.mxu1 %v2653_v44 }
 0x658   :  { %1690 = vperm.xlu0 %2365, %v1676_v45   ;;  %2284 = vmatpush3.msra.mxu0 %v1809_v20 }
 0x659   :  { %2319 = vmatpush3.msra.mxu1 %v1791_v28  ;;  %2285 = vmatprep.subr.mxu0 %v2653_v44 }
 0x65a   :  { %2320 = vmatprep.subr.mxu1 %v2653_v44  ;;  %2286 = vmatpush3.msra.mxu0 %v1808_v19 }
 0x65b   :  { %2321 = vmatpush3.msra.mxu1 %v1790_v30  ;;  %2287 = vmatprep.subr.mxu0 %v2653_v44 }
 0x65c   :  { %1695 = vperm.xlu0 %2365, %v1677_v16   ;;  %2322 = vmatprep.subr.mxu1 %v2653_v44 }
 0x65d   :  { %2288 = vmatpush3.msra.mxu0 %v1807_v21  ;;  %2323 = vmatpush3.msra.mxu1 %v1789_v4 }
 0x65e   :  { %2289 = vmatprep.subr.mxu0 %v2653_v44  ;;  %2324 = vmatprep.subr.mxu1 %v2653_v44 }
 0x65f   :  { %2290 = vmatpush3.msra.mxu0 %v1806_v5  ;;  %2325 = vmatpush3.msra.mxu1 %v1788_v63 }
 0x660   :  { %1700 = vperm.xlu0 %2365, %v1678_v18   ;;  %2291 = vmatprep.subr.mxu0 %v2653_v44 }
 0x661   :  { %2326 = vmatprep.subr.mxu1 %v2653_v44  ;;  %2292 = vmatpush3.msra.mxu0 %v1805_v7 }
 0x662   :  { %2327 = vmatpush3.msra.mxu1 %v1787_v32  ;;  %2293 = vmatprep.subr.mxu0 %v2653_v44 }
 0x663   :  { %2328 = vmatprep.subr.mxu1 %v2653_v44  ;;  %2294 = vmatpush3.msra.mxu0 %v1804_v27 }
 0x664   :  { %1705 = vperm.xlu0 %2365, %v1679_v52   ;;  %2329 = vmatpush3.msra.mxu1 %v1786_v1 }
 0x665   :  { %2295 = vmatprep.subr.mxu0 %v2653_v44  ;;  %2330 = vmatprep.subr.mxu1 %v2653_v44 }
 0x666   :  { %2296 = vmatpush3.msra.mxu0 %v1803_v8  ;;  %2331 = vmatpush3.msra.mxu1 %v1785_v9 }
 0x667   :  { %2297 = vmatprep.subr.mxu0 %v2653_v44  ;;  %2332 = vmatprep.subr.mxu1 %v2653_v44 }
 0x668   :  { %1710 = vperm.xlu0 %2365, %v1680_v3   ;;  %2298 = vmatpush3.msra.mxu0 %v1802_v0 }
 0x669   :  { %2333 = vmatpush3.msra.mxu1 %v1784_v10  ;;  %2299 = vmatprep.subr.mxu0 %v2653_v44 }
 0x66a   :  { %2334 = vmatprep.subr.mxu1 %v2653_v44  ;;  %2300 = vmatpush3.msra.mxu0 %v1801_v22 }
 0x66b   :  { %2335 = vmatpush3.msra.mxu1 %v1783_v11  ;;  %2301 = vmatprep.subr.mxu0 %v2653_v44 }
 0x66c   :  { %1715 = vperm.xlu0 %2365, %v1681_v6   ;;  %2336 = vmatprep.subr.mxu1 %v2653_v44 }
 0x66d   :  { %2302 = vmatpush3.msra.mxu0 %v1800_v2  ;;  %2337 = vmatpush3.msra.mxu1 %v1782_v12 }
 0x66e   :  { %2303 = vmatprep.subr.mxu0 %v2653_v44  ;;  %2338 = vmatprep.subr.mxu1 %v2653_v44 }
 0x66f   :  { %2304 = vmatpush3.msra.mxu0 %v1799_v13  ;;  %2339 = vmatpush3.msra.mxu1 %v1781_v14 }
 0x670   :  { %2305 = vmatprep.subr.mxu0 %v2653_v44  ;;  %2340 = vmatprep.subr.mxu1 %v2653_v44 }
 0x671   :  { %2306 = vmatpush3.msra.mxu0 %v1798_v35  ;;  %2341 = vmatpush3.msra.mxu1 %v1780_v15 }
 0x672   :  { %2307 = vmatprep.subr.mxu0 %v2653_v44  ;;  %2342 = vmatprep.subr.mxu1 %v2653_v44 }
 0x673   :  { %2308 = vmatpush3.msra.mxu0 %v1797_v46  ;;  %2343 = vmatpush3.msra.mxu1 %v1779_v59 }
 0x674   :  { %2310 = vmatmul.mubr.f32.vlgmr.msra.gmra.mxu0 %v1796_v53 }
 0x6cf   :  { %v1686_v60 = vpop.permute.xlu0 %1685  ;;  %v1721_v56 = vpop.permute.xlu1 %1720 }
 0x6d0   :  { %v1723_v24 = vmul.f32 %v2742_v29, %v1686_v60  ;;  %v1730_v31 = vmul.f32 %v2767_v43, %v1721_v56 }
 0x6d2   :  { %v1731_v54 = vrot.slane %v1723_v24, 4  ;;  %v1773_v29 = vrot.slane %v1730_v31, 4 }
 0x6d3   :  { %v1691_v17 = vpop.permute.xlu0 %1690 }
 0x6d4   :  { %v1724_v61 = vmul.f32 %v2745_v34, %v1691_v17  ;;  %v1732_v26 = vadd.f32 %v1731_v54, %v1723_v24  ;;  %v1774_v20 = vadd.f32 %v1773_v29, %v1730_v31 }
 0x6d6   :  { %v1737_v37 = vrot.slane %v1724_v61, 4  ;;  %v1733_v49 = vrot.slane %v1732_v26, 2  ;;  %v1775_v5 = vrot.slane %v1774_v20, 2 }
 0x6d7   :  { %v1696_v25 = vpop.permute.xlu0 %1695 }
 0x6d8   :  { %v1725_v47 = vmul.f32 %v2747_v36, %v1696_v25  ;;  %v1738_v44 = vadd.f32 %v1737_v37, %v1724_v61  ;;  %v1734_v58 = vadd.f32 %v1733_v49, %v1732_v26  ;;  %v1776_v10 = vadd.f32 %v1775_v5, %v1774_v20 }
 0x6da   :  { %v1743_v57 = vrot.slane %v1725_v47, 4  ;;  %v1739_v50 = vrot.slane %v1738_v44, 2  ;;  %v1735_v1 = vrot.slane %v1734_v58, 1 }
 0x6db   :  { %v1701_v45 = vpop.permute.xlu0 %1700 }
 0x6dc   :  { %v1726_v16 = vmul.f32 %v2750_v38, %v1701_v45  ;;  %v1744_v62 = vadd.f32 %v1743_v57, %v1725_v47  ;;  %v1740_v28 = vadd.f32 %v1739_v50, %v1738_v44  ;;  %v1736_v13 = vadd.f32 %v1735_v1, %v1734_v58 }
 0x6de   :  { %v1749_v18 = vrot.slane %v1726_v16, 4  ;;  %v1745_v36 = vrot.slane %v1744_v62, 2  ;;  %v1741_v63 = vrot.slane %v1740_v28, 1 }
 0x6df   :  { %v1706_v23 = vpop.permute.xlu0 %1705 }
 0x6e0   :  { %v1727_v34 = vmul.f32 %v2753_v39, %v1706_v23  ;;  %v1750_v33 = vadd.f32 %v1749_v18, %v1726_v16  ;;  %v1746_v38 = vadd.f32 %v1745_v36, %v1744_v62  ;;  %v1742_v22 = vadd.f32 %v1741_v63, %v1740_v28 }
 0x6e2   :  { %v1755_v48 = vrot.slane %v1727_v34, 4  ;;  %v1751_v52 = vrot.slane %v1750_v33, 2  ;;  %v1747_v7 = vrot.slane %v1746_v38, 1  ;;  %v1891_v15 = vsel %vm1340_vm4, %v1742_v22, %v1736_v13 }
 0x6e3   :  { %v1711_v55 = vpop.permute.xlu0 %1710 }
 0x6e4   :  { %v1756_v51 = vadd.f32 %v1755_v48, %v1727_v34  ;;  %v1728_v43 = vmul.f32 %v2759_v41, %v1711_v55  ;;  %v1752_v30 = vadd.f32 %v1751_v52, %v1750_v33  ;;  %v1748_v11 = vadd.f32 %v1747_v7, %v1746_v38 }
 0x6e6   :  { %v1757_v19 = vrot.slane %v1756_v51, 2  ;;  %v1761_v3 = vrot.slane %v1728_v43, 4  ;;  %v1753_v8 = vrot.slane %v1752_v30, 1  ;;  %v1892_v59 = vsel %vm1342_vm5, %v1748_v11, %v1891_v15 }
 0x6e7   :  { %v1716_v21 = vpop.permute.xlu0 %1715 }
 0x6e8   :  { %v1758_v39 = vadd.f32 %v1757_v19, %v1756_v51  ;;  %v1762_v4 = vadd.f32 %v1761_v3, %v1728_v43  ;;  %v1729_v6 = vmul.f32 %v2762_v42, %v1716_v21  ;;  %v1754_v14 = vadd.f32 %v1753_v8, %v1752_v30 }
 0x6e9   :  { %v1777_v42 = vrot.slane %v1776_v10, 1 }
 0x6ea   :  { %v1763_v32 = vrot.slane %v1762_v4, 2  ;;  %v1767_v27 = vrot.slane %v1729_v6, 4  ;;  %v1759_v41 = vrot.slane %v1758_v39, 1  ;;  %v1893_v60 = vsel %vm1344_vm6, %v1754_v14, %v1892_v59 }
 0x6eb   :  { %v1778_v24 = vadd.f32 %v1777_v42, %v1776_v10 }
 0x6ec   :  { %v1764_v9 = vadd.f32 %v1763_v32, %v1762_v4  ;;  %v1768_v0 = vadd.f32 %v1767_v27, %v1729_v6  ;;  %v1760_v40 = vadd.f32 %v1759_v41, %v1758_v39 }
 0x6ee   :  { %v1765_v2 = vrot.slane %v1764_v9, 1  ;;  %v1769_v12 = vrot.slane %v1768_v0, 2  ;;  %v1894_v61 = vsel %vm1346_vm7, %v1760_v40, %v1893_v60 }
 0x6f0   :  { %v1770_v35 = vadd.f32 %v1769_v12, %v1768_v0  ;;  %v1766_v46 = vadd.f32 %v1765_v2, %v1764_v9 }
 0x6f2   :  { %v1771_v53 = vrot.slane %v1770_v35, 1  ;;  %v1895_v25 = vsel %vm1348_vm8, %v1766_v46, %v1894_v61 }
 0x6f4   :  { %v1772_v17 = vadd.f32 %v1771_v53, %v1770_v35 }
 0x6f6   :  { %v1896_v47 = vsel %vm1350_vm9, %v1772_v17, %v1895_v25 }
 0x6f7   :  { %v1897_v37 = vsel %vm1352_vm10, %v1778_v24, %v1896_v47 }
 0x6f8   :  { %2345 = vmatmul.mubr.f32.vlgmr.msra.gmra.mxu1 %v1897_v37 }
 0x734   :  { %v1879_v56 = vpop.f32.mrf.mxu0 }
 0x736   :  { %v2311_v57 = vpop.f32.mrf.mxu0 }
 0x737   :  { %2601 = shalt.err (!%p2598_p11)
}
 0x738   :  { %2000 = dma.vmem_to_hbm [thread:$0]  %s1995_s6, 1024, %s3101_s9, [#allocation16], %s2644_s17, %s2644_s17, %s2645_s18  }
 0x739   :  { %v2031_v45 = vld [vmem:[%s3099_s7] ss:$0 sm:$0xff]  ;;  %s2658_s27 = smov [#allocation14]  }
 0x73a   :  { %s1985_s28 = sshll.u32 %s2658_s27, 4  ;;  %s1986_s28 = int_to_ptr.vmem [resolvable:$true] %s1985_s28 }
 0x73b   :  { %s2610_s29 = scalar_lea.vmem %s1986_s28, 64  ;;  %p2615_p13 = scmp.lt.s32.totalorder %s1986_s28, %s1986_s28 }
 0x73c   :  { %p2611_p12 = scmp.ne.s32.totalorder %s1986_s28, %s2610_s29  ;;  %p2616_p0 = scmp.lt.s32.totalorder %s2610_s29, %s2610_s29 }
 0x73e   :  { %p2617_p1 = por %p2616_p0, %p2615_p13 }
 0x740   :  { %p2618_p2 = pnand %p2617_p1, %p2611_p12 }
 0x7b8   :  { %v1965_v54 = vpop.f32.mrf.mxu1 }
 0x7b9   :  { %v1966_v31 = vadd.f32 %v1965_v54, %v1879_v56 }
 0x7ba   :  { %v2346_v44 = vpop.f32.mrf.mxu1 }
 0x7bb   :  { %v1976_v16 = vadd.f32 %v2031_v45, %v1966_v31 }
 0x7bd   :  { %v1977_v62 = vpack.c.bf16 %v1976_v16, %v1976_v16 }
 0x7bf   :  { %1978 = vst [vmem:[#allocation14] sm:$0xf] %v1977_v62 }
 0x7c0   :  { %2621 = shalt.err (!%p2618_p2)
}
 0x7c1   :  { %1988 = dma.vmem_to_hbm [thread:$0]  %s1986_s28, 64, %s3100_s8, [#allocation4]  }
 0x7c2   :  { %2638 = dma.done.wait [#allocation4], 64  }
 0x7c3   :  { %2639 = vsyncadd [#allocation4], 4294967232 }
 0x7c4   :  { %2640 = dma.done.wait [#allocation16], 1024  }
 0x7c5   :  { %2641 = vsyncadd [#allocation16], 4294966272 }
 0x7c6   :  { %2007 = vsyncpa [#allocation3], 1 }
 0x7c7   :  { %2008 = vsyncpa [#allocation6], 1 }
 0x7c8   :  { %2009 = vsyncpa [#allocation9], 1 }
 0x7c9   :  { %2010 = vsyncpa [#allocation12], 1 }
 0x7ca   :  { %2011 = vsyncpa [#allocation4], 1 }
 0x7cb   :  { %2012 = vsyncpa [#allocation16], 1 }

</bundles_post_ra>
